<compile_context>
chip_gen: v5e
topology: v5e:2x2
jax: 0.10.0
libtpu: 0.0.40
codegen_flags: <defaults>
</compile_context>

<pallas_src>
import jax
import jax.numpy as jnp
from jax import lax
from jax.experimental import pallas as pl
from jax.experimental.pallas import tpu as pltpu

EPS = 1e-5

# Tap offsets (oy, ox), PyTorch kernel-iteration order.
OFF3 = tuple((ky - 1, kx - 1) for ky in range(3) for kx in range(3))   # 3x3, pad 1
OFFV = tuple((ky - 2, 0) for ky in range(5))                           # 5x1, pad (2,0)
OFFH = tuple((0, kx - 2) for kx in range(5))                           # 1x5, pad (0,2)
STROKE_OFFS = tuple(dict.fromkeys(OFFV + OFFH))                        # 9 unique
UNIQUE_OFFSETS = tuple(dict.fromkeys(OFF3 + STROKE_OFFS))              # 13 unique


def _make_kernel(block_n, C, CP, H, W, mask_row):
    HW = H * W
    HWB = block_n * HW
    inv_hw = 1.0 / HW            # Python float -> jaxpr literal (no captured const)

    def kernel(x_ref, m_ref, seg_ref, segT_ref,
               w1_ref, b1_ref, ws_ref, bs_ref, wc_ref, bc_ref,
               w2_ref, b2_ref, o_ref):
        x = x_ref[0]                                            # (CP, HWB) f32

        def shifted(feat, off):
            # shifted[c, n*HW + y*W + x] = feat[c, n*HW + (y+oy)*W + (x+ox)],
            # zeroed where (y+oy, x+ox) leaves the sample.  jnp.roll with a
            # static shift lowers to lane rotations (XLU); wrong-row /
            # cross-sample reads are exactly the mask-zeroed positions.
            oy, ox = off
            d = oy * W + ox
            r = feat if d == 0 else jnp.roll(feat, -d, axis=1)
            if off == (0, 0):
                return r                                        # all-ones mask
            return r * m_ref[pl.ds(mask_row[off], 1), :]

        def conv(feat, w_ref, b_ref, offsets):
            # Aligned (T*CP, HWB) f32 tap slab -> single bf16 MXU matmul.
            slab = jnp.concatenate([shifted(feat, off) for off in offsets],
                                   axis=0)
            return jnp.dot(w_ref[...], slab.astype(jnp.bfloat16),
                           preferred_element_type=jnp.float32) + b_ref[...]

        def instance_norm(f):                                   # (CP, HWB) f32
            # Per-sample sums / sums-of-squares on the MXU (seg is 0/1).
            fcat = jnp.concatenate([f, f * f], axis=0)          # (2CP, HWB)
            stats = jnp.dot(fcat, seg_ref[...],
                            preferred_element_type=jnp.float32)  # (2CP, bn)
            m = stats[:CP] * inv_hw
            var = jnp.maximum(stats[CP:] * inv_hw - m * m, 0.0)
            scale = lax.rsqrt(var + EPS)                        # (CP, bn)
            shift = m * scale
            if block_n == 1:
                return f * scale - shift                        # lane broadcast
            ss = jnp.concatenate([scale, shift], axis=0)        # (2CP, bn)
            ssf = jnp.dot(ss, segT_ref[...],
                          preferred_element_type=jnp.float32)   # (2CP, HWB)
            return f * ssf[:CP] - ssf[CP:]

        # Conv3x3 -> InstanceNorm -> ReLU
        y = jnp.maximum(instance_norm(conv(x, w1_ref, b1_ref, OFF3)), 0.0)
        # Fused 5x1 / 1x5 stroke convs (block-diagonal packed weight) -> ReLU
        s = jnp.maximum(conv(y, ws_ref, bs_ref, STROKE_OFFS), 0.0)
        # 1x1 combine conv -> InstanceNorm
        c = instance_norm(
            jnp.dot(wc_ref[...], s.astype(jnp.bfloat16),
                    preferred_element_type=jnp.float32) + bc_ref[...])
        # Conv3x3 -> InstanceNorm, residual add
        o_ref[0] = x + instance_norm(conv(c, w2_ref, b2_ref, OFF3))

    return kernel


# ----------------------------- weight packing --------------------------------

def _pad2(a, CP):
    co, ci = a.shape
    return jnp.pad(a.astype(jnp.float32), ((0, CP - co), (0, CP - ci)))


def _pack_conv3(w, CP):
    blocks = [_pad2(w[:, :, oy + 1, ox + 1], CP) for (oy, ox) in OFF3]
    return jnp.concatenate(blocks, axis=1).astype(jnp.bfloat16)    # (CP, 9*CP)


def _pack_stroke(wv, wh, C, CP):
    ch = C // 2
    blocks = []
    for off in STROKE_OFFS:
        blk = jnp.zeros((CP, CP), jnp.float32)
        if off in OFFV:
            blk = blk.at[:ch, :C].set(wv[:, :, off[0] + 2, 0].astype(jnp.float32))
        if off in OFFH:
            blk = blk.at[ch:C, :C].set(wh[:, :, 0, off[1] + 2].astype(jnp.float32))
        blocks.append(blk)
    return jnp.concatenate(blocks, axis=1).astype(jnp.bfloat16)    # (CP, 9*CP)


def _pad_bias(b, CP):
    return jnp.pad(b.astype(jnp.float32), (0, CP - b.shape[0])).reshape(CP, 1)


# --------------------------------- wrapper ------------------------------------

def stroke_aware_residual_block(x, params):
    """x: (N, C, H, W) float32 (NCHW, like PyTorch).  Returns (N, C, H, W)."""
    N, C, H, W = x.shape
    HW = H * W
    CP = max(8, -(-C // 8) * 8)                 # channels padded to f32 sublane tile
    w1, b1, wv, bv, wh, bh, wc, bc, w2, b2 = params

    # Program / block sizing: >=2 programs when possible (fills both v7x TCs);
    # block_n capped so the biggest f32 tap slab (9*CP, block_n*HW) stays ~4 MiB.
    max_block_n = max(1, (4 << 20) // (9 * CP * HW * 4))
    if N <= 2 * max_block_n:
        num_programs = min(N, 2)
    else:
        num_programs = pl.cdiv(N, max_block_n)
    block_n = pl.cdiv(N, num_programs)
    num_programs = pl.cdiv(N, block_n)
    n_pad = num_programs * block_n
    HWB = block_n * HW

    # Input: pad batch/channels, pack each program's samples along lanes.
    xp = jnp.pad(x.astype(jnp.float32),
                 ((0, n_pad - N), (0, CP - C), (0, 0), (0, 0)))
    xp = xp.reshape(num_programs, block_n, CP, HW)
    xp = jnp.transpose(xp, (0, 2, 1, 3)).reshape(num_programs, CP, HWB)

    # Packed weights (bf16) / biases (f32, column vectors).
    w1p = _pack_conv3(w1, CP);  b1c = _pad_bias(b1, CP)
    w2p = _pack_conv3(w2, CP);  b2c = _pad_bias(b2, CP)
    wsp = _pack_stroke(wv, wh, C, CP)
    bsc = _pad_bias(jnp.concatenate([bv, bh]), CP)
    wcp = _pad2(wc[:, :, 0, 0], CP).astype(jnp.bfloat16)
    bcc = _pad_bias(bc, CP)

    # Host-precomputed boundary masks (one row per non-trivial offset, tiled
    # over the block's samples) and per-sample 0/1 segment selectors.
    ys = jnp.arange(H).reshape(H, 1)
    xs = jnp.arange(W).reshape(1, W)
    mask_row, rows = {}, []
    for off in UNIQUE_OFFSETS:
        if off == (0, 0):
            continue
        oy, ox = off
        valid = ((ys + oy >= 0) & (ys + oy < H) &
                 (xs + ox >= 0) & (xs + ox < W))
        mask_row[off] = len(rows)
        rows.append(jnp.tile(valid.astype(jnp.float32).reshape(HW), block_n))
    pad_rows = (-len(rows)) % 8
    masks = jnp.stack(rows + [jnp.zeros((HWB,), jnp.float32)] * pad_rows)

    seg = (jnp.arange(HWB)[:, None] // HW ==
           jnp.arange(block_n)[None, :]).astype(jnp.float32)       # (HWB, bn)
    segT = jnp.transpose(seg)                                      # (bn, HWB)

    def rep(shape):
        return pl.BlockSpec(shape, lambda p: (0,) * len(shape))

    kernel = _make_kernel(block_n, C, CP, H, W, mask_row)
    out = pl.pallas_call(
        kernel,
        out_shape=jax.ShapeDtypeStruct((num_programs, CP, HWB), jnp.float32),
        grid=(num_programs,),
        in_specs=[
            pl.BlockSpec((1, CP, HWB), lambda p: (p, 0, 0)),
            rep(masks.shape), rep(seg.shape), rep(segT.shape),
            rep(w1p.shape), rep(b1c.shape),
            rep(wsp.shape), rep(bsc.shape),
            rep(wcp.shape), rep(bcc.shape),
            rep(w2p.shape), rep(b2c.shape),
        ],
        out_specs=pl.BlockSpec((1, CP, HWB), lambda p: (p, 0, 0)),
        compiler_params=pltpu.CompilerParams(
            dimension_semantics=("parallel",),
            vmem_limit_bytes=64 * 1024 * 1024),
    )(xp, masks, seg, segT, w1p, b1c, wsp, bsc, wcp, bcc, w2p, b2c)

    out = out.reshape(num_programs, CP, block_n, HW)
    out = jnp.transpose(out, (0, 2, 1, 3)).reshape(n_pad, CP, HW)
    return out[:N, :C].reshape(N, C, H, W)


# ------------------------------- reference ------------------------------------

def _reference(x, params):
    """Pure-JAX reference matching the PyTorch module (high precision)."""
    w1, b1, wv, bv, wh, bh, wc, bc, w2, b2 = params

    def conv(t, w, b, pad):
        y = lax.conv_general_dilated(
            t, w, (1, 1), pad,
            dimension_numbers=("NCHW", "OIHW", "NCHW"),
            precision=lax.Precision.HIGHEST)
        return y + b[None, :, None, None]

    def inorm(t):
        m = jnp.mean(t, axis=(2, 3), keepdims=True)
        v = jnp.mean((t - m) ** 2, axis=(2, 3), keepdims=True)
        return (t - m) * lax.rsqrt(v + EPS)

    y = conv(x, w1, b1, ((1, 1), (1, 1)))
    y = jnp.maximum(inorm(y), 0.0)
    vs = conv(y, wv, bv, ((2, 2), (0, 0)))
    hs = conv(y, wh, bh, ((0, 0), (2, 2)))
    cat = jnp.maximum(jnp.concatenate([vs, hs], axis=1), 0.0)
    c = inorm(conv(cat, wc, bc, ((0, 0), (0, 0))))
    y2 = conv(c, w2, b2, ((1, 1), (1, 1)))
    return x + inorm(y2)


if __name__ == "__main__":
    N, C, H, W = 2, 4, 16, 16
    key = jax.random.PRNGKey(0)
    ks = jax.random.split(key, 11)
    x = jax.random.normal(ks[0], (N, C, H, W), jnp.float32)

    def u(k, shape, fan_in):
        bound = 1.0 / (fan_in ** 0.5)
        return jax.random.uniform(k, shape, jnp.float32, -bound, bound)

    w1 = u(ks[1], (C, C, 3, 3), C * 9); b1 = u(ks[2], (C,), C * 9)
    wv = u(ks[3], (C // 2, C, 5, 1), C * 5); bv = u(ks[4], (C // 2,), C * 5)
    wh = u(ks[5], (C // 2, C, 1, 5), C * 5); bh = u(ks[6], (C // 2,), C * 5)
    wc = u(ks[7], (C, C, 1, 1), C); bc = u(ks[8], (C,), C)
    w2 = u(ks[9], (C, C, 3, 3), C * 9); b2 = u(ks[10], (C,), C * 9)
    params = (w1, b1, wv, bv, wh, bh, wc, bc, w2, b2)

    out = jax.block_until_ready(stroke_aware_residual_block(x, params))
    assert out.shape == (N, C, H, W)
    assert bool(jnp.all(jnp.isfinite(out)))

    ref = jax.block_until_ready(_reference(x, params))
    err = float(jnp.max(jnp.abs(out - ref)))
    # Single-pass bf16 MXU through 4 packed-tap matmuls + 3 instance norms gives
    # ~1e-2-scale absolute error vs the f32 HIGHEST-precision reference;
    # structural bugs would show up as O(1) errors.
    assert err < 1e-1, f"max abs error {err}"

    print("KERNEL_OK")
</pallas_src>

<mosaic_0001>
module attributes {stable_mosaic.version = 11 : i64} {
  func.func @kernel(%arg0: i32, %arg1: memref<1x8x256xf32, #tpu.memory_space<vmem>>, %arg2: memref<16x256xf32, #tpu.memory_space<vmem>>, %arg3: memref<256x1xf32, #tpu.memory_space<vmem>>, %arg4: memref<1x256xf32, #tpu.memory_space<vmem>>, %arg5: memref<8x72xbf16, #tpu.memory_space<vmem>>, %arg6: memref<8x1xf32, #tpu.memory_space<vmem>>, %arg7: memref<8x72xbf16, #tpu.memory_space<vmem>>, %arg8: memref<8x1xf32, #tpu.memory_space<vmem>>, %arg9: memref<8x8xbf16, #tpu.memory_space<vmem>>, %arg10: memref<8x1xf32, #tpu.memory_space<vmem>>, %arg11: memref<8x72xbf16, #tpu.memory_space<vmem>>, %arg12: memref<8x1xf32, #tpu.memory_space<vmem>>, %arg13: memref<1x8x256xf32, #tpu.memory_space<vmem>>) attributes {dimension_semantics = [#tpu.dimension_semantics<parallel>], iteration_bounds = array<i64: 2>, scalar_prefetch = 0 : i64, scratch_operands = 0 : i64, tpu.core_type = #tpu.core_type<tc>, window_params = [{transform_indices = @transform_0, window_bounds = array<i64: 1, 8, 256>}, {pipeline_mode = #tpu.pipeline_mode<synchronous>, transform_indices = @transform_1, window_bounds = array<i64: 16, 256>}, {pipeline_mode = #tpu.pipeline_mode<synchronous>, transform_indices = @transform_2, window_bounds = array<i64: 256, 1>}, {pipeline_mode = #tpu.pipeline_mode<synchronous>, transform_indices = @transform_3, window_bounds = array<i64: 1, 256>}, {pipeline_mode = #tpu.pipeline_mode<synchronous>, transform_indices = @transform_4, window_bounds = array<i64: 8, 72>}, {pipeline_mode = #tpu.pipeline_mode<synchronous>, transform_indices = @transform_5, window_bounds = array<i64: 8, 1>}, {pipeline_mode = #tpu.pipeline_mode<synchronous>, transform_indices = @transform_6, window_bounds = array<i64: 8, 72>}, {pipeline_mode = #tpu.pipeline_mode<synchronous>, transform_indices = @transform_7, window_bounds = array<i64: 8, 1>}, {pipeline_mode = #tpu.pipeline_mode<synchronous>, transform_indices = @transform_8, window_bounds = array<i64: 8, 8>}, {pipeline_mode = #tpu.pipeline_mode<synchronous>, transform_indices = @transform_9, window_bounds = array<i64: 8, 1>}, {pipeline_mode = #tpu.pipeline_mode<synchronous>, transform_indices = @transform_10, window_bounds = array<i64: 8, 72>}, {pipeline_mode = #tpu.pipeline_mode<synchronous>, transform_indices = @transform_11, window_bounds = array<i64: 8, 1>}, {transform_indices = @transform_12, window_bounds = array<i64: 1, 8, 256>}]} {
    %c0 = arith.constant 0 : index
    %c0_0 = arith.constant 0 : index
    %c0_1 = arith.constant 0 : index
    %0 = vector.load %arg1[%c0, %c0_0, %c0_1] : memref<1x8x256xf32, #tpu.memory_space<vmem>>, vector<1x8x256xf32>
    %1 = vector.shape_cast %0 : vector<1x8x256xf32> to vector<8x256xf32>
    %2 = vector.extract_strided_slice %1 {offsets = [0, 239], sizes = [8, 17], strides = [1, 1]} : vector<8x256xf32> to vector<8x17xf32>
    %3 = vector.extract_strided_slice %1 {offsets = [0, 0], sizes = [8, 239], strides = [1, 1]} : vector<8x256xf32> to vector<8x239xf32>
    %4 = tpu.concatenate %2, %3 in 1 : vector<8x17xf32>, vector<8x239xf32> -> vector<8x256xf32>
    %c0_2 = arith.constant 0 : index
    %c0_3 = arith.constant 0 : index
    %5 = vector.load %arg2[%c0_2, %c0_3] : memref<16x256xf32, #tpu.memory_space<vmem>>, vector<1x256xf32>
    %6 = vector.broadcast %5 : vector<1x256xf32> to vector<8x256xf32>
    %7 = arith.mulf %4, %6 : vector<8x256xf32>
    %8 = vector.extract_strided_slice %1 {offsets = [0, 240], sizes = [8, 16], strides = [1, 1]} : vector<8x256xf32> to vector<8x16xf32>
    %9 = vector.extract_strided_slice %1 {offsets = [0, 0], sizes = [8, 240], strides = [1, 1]} : vector<8x256xf32> to vector<8x240xf32>
    %10 = tpu.concatenate %8, %9 in 1 : vector<8x16xf32>, vector<8x240xf32> -> vector<8x256xf32>
    %c1 = arith.constant 1 : index
    %c0_4 = arith.constant 0 : index
    %11 = vector.load %arg2[%c1, %c0_4] : memref<16x256xf32, #tpu.memory_space<vmem>>, vector<1x256xf32>
    %12 = vector.broadcast %11 : vector<1x256xf32> to vector<8x256xf32>
    %13 = arith.mulf %10, %12 : vector<8x256xf32>
    %14 = vector.extract_strided_slice %1 {offsets = [0, 241], sizes = [8, 15], strides = [1, 1]} : vector<8x256xf32> to vector<8x15xf32>
    %15 = vector.extract_strided_slice %1 {offsets = [0, 0], sizes = [8, 241], strides = [1, 1]} : vector<8x256xf32> to vector<8x241xf32>
    %16 = tpu.concatenate %14, %15 in 1 : vector<8x15xf32>, vector<8x241xf32> -> vector<8x256xf32>
    %c2 = arith.constant 2 : index
    %c0_5 = arith.constant 0 : index
    %17 = vector.load %arg2[%c2, %c0_5] : memref<16x256xf32, #tpu.memory_space<vmem>>, vector<1x256xf32>
    %18 = vector.broadcast %17 : vector<1x256xf32> to vector<8x256xf32>
    %19 = arith.mulf %16, %18 : vector<8x256xf32>
    %20 = vector.extract_strided_slice %1 {offsets = [0, 255], sizes = [8, 1], strides = [1, 1]} : vector<8x256xf32> to vector<8x1xf32>
    %21 = vector.extract_strided_slice %1 {offsets = [0, 0], sizes = [8, 255], strides = [1, 1]} : vector<8x256xf32> to vector<8x255xf32>
    %22 = tpu.concatenate %20, %21 in 1 : vector<8x1xf32>, vector<8x255xf32> -> vector<8x256xf32>
    %c3 = arith.constant 3 : index
    %c0_6 = arith.constant 0 : index
    %23 = vector.load %arg2[%c3, %c0_6] : memref<16x256xf32, #tpu.memory_space<vmem>>, vector<1x256xf32>
    %24 = vector.broadcast %23 : vector<1x256xf32> to vector<8x256xf32>
    %25 = arith.mulf %22, %24 : vector<8x256xf32>
    %26 = vector.extract_strided_slice %1 {offsets = [0, 1], sizes = [8, 255], strides = [1, 1]} : vector<8x256xf32> to vector<8x255xf32>
    %27 = vector.extract_strided_slice %1 {offsets = [0, 0], sizes = [8, 1], strides = [1, 1]} : vector<8x256xf32> to vector<8x1xf32>
    %28 = tpu.concatenate %26, %27 in 1 : vector<8x255xf32>, vector<8x1xf32> -> vector<8x256xf32>
    %c4 = arith.constant 4 : index
    %c0_7 = arith.constant 0 : index
    %29 = vector.load %arg2[%c4, %c0_7] : memref<16x256xf32, #tpu.memory_space<vmem>>, vector<1x256xf32>
    %30 = vector.broadcast %29 : vector<1x256xf32> to vector<8x256xf32>
    %31 = arith.mulf %28, %30 : vector<8x256xf32>
    %32 = vector.extract_strided_slice %1 {offsets = [0, 15], sizes = [8, 241], strides = [1, 1]} : vector<8x256xf32> to vector<8x241xf32>
    %33 = vector.extract_strided_slice %1 {offsets = [0, 0], sizes = [8, 15], strides = [1, 1]} : vector<8x256xf32> to vector<8x15xf32>
    %34 = tpu.concatenate %32, %33 in 1 : vector<8x241xf32>, vector<8x15xf32> -> vector<8x256xf32>
    %c5 = arith.constant 5 : index
    %c0_8 = arith.constant 0 : index
    %35 = vector.load %arg2[%c5, %c0_8] : memref<16x256xf32, #tpu.memory_space<vmem>>, vector<1x256xf32>
    %36 = vector.broadcast %35 : vector<1x256xf32> to vector<8x256xf32>
    %37 = arith.mulf %34, %36 : vector<8x256xf32>
    %38 = vector.extract_strided_slice %1 {offsets = [0, 16], sizes = [8, 240], strides = [1, 1]} : vector<8x256xf32> to vector<8x240xf32>
    %39 = vector.extract_strided_slice %1 {offsets = [0, 0], sizes = [8, 16], strides = [1, 1]} : vector<8x256xf32> to vector<8x16xf32>
    %40 = tpu.concatenate %38, %39 in 1 : vector<8x240xf32>, vector<8x16xf32> -> vector<8x256xf32>
    %c6 = arith.constant 6 : index
    %c0_9 = arith.constant 0 : index
    %41 = vector.load %arg2[%c6, %c0_9] : memref<16x256xf32, #tpu.memory_space<vmem>>, vector<1x256xf32>
    %42 = vector.broadcast %41 : vector<1x256xf32> to vector<8x256xf32>
    %43 = arith.mulf %40, %42 : vector<8x256xf32>
    %44 = vector.extract_strided_slice %1 {offsets = [0, 17], sizes = [8, 239], strides = [1, 1]} : vector<8x256xf32> to vector<8x239xf32>
    %45 = vector.extract_strided_slice %1 {offsets = [0, 0], sizes = [8, 17], strides = [1, 1]} : vector<8x256xf32> to vector<8x17xf32>
    %46 = tpu.concatenate %44, %45 in 1 : vector<8x239xf32>, vector<8x17xf32> -> vector<8x256xf32>
    %c7 = arith.constant 7 : index
    %c0_10 = arith.constant 0 : index
    %47 = vector.load %arg2[%c7, %c0_10] : memref<16x256xf32, #tpu.memory_space<vmem>>, vector<1x256xf32>
    %48 = vector.broadcast %47 : vector<1x256xf32> to vector<8x256xf32>
    %49 = arith.mulf %46, %48 : vector<8x256xf32>
    %50 = tpu.concatenate %7, %13, %19, %25, %1, %31, %37, %43, %49 in 0 : vector<8x256xf32>, vector<8x256xf32>, vector<8x256xf32>, vector<8x256xf32>, vector<8x256xf32>, vector<8x256xf32>, vector<8x256xf32>, vector<8x256xf32>, vector<8x256xf32> -> vector<72x256xf32>
    %c0_11 = arith.constant 0 : index
    %c0_12 = arith.constant 0 : index
    %51 = vector.load %arg5[%c0_11, %c0_12] : memref<8x72xbf16, #tpu.memory_space<vmem>>, vector<8x72xbf16>
    %52 = arith.truncf %50 : vector<72x256xf32> to vector<72x256xbf16>
    %cst = arith.constant dense<0.000000e+00> : vector<8x256xf32>
    %53 = tpu.matmul %51, %52, %cst {dimension_numbers = #tpu.dot_dimension_numbers<[1], [0], [0], [1], [0, 0, 1, 1], [], []>} : vector<8x72xbf16>, vector<72x256xbf16>, vector<8x256xf32> -> vector<8x256xf32>
    %c0_13 = arith.constant 0 : index
    %c0_14 = arith.constant 0 : index
    %54 = vector.load %arg6[%c0_13, %c0_14] : memref<8x1xf32, #tpu.memory_space<vmem>>, vector<8x1xf32>
    %55 = vector.broadcast %54 : vector<8x1xf32> to vector<8x256xf32>
    %56 = arith.addf %53, %55 : vector<8x256xf32>
    %57 = arith.mulf %56, %56 : vector<8x256xf32>
    %58 = tpu.concatenate %56, %57 in 0 : vector<8x256xf32>, vector<8x256xf32> -> vector<16x256xf32>
    %c0_15 = arith.constant 0 : index
    %c0_16 = arith.constant 0 : index
    %59 = vector.load %arg3[%c0_15, %c0_16] : memref<256x1xf32, #tpu.memory_space<vmem>>, vector<256x1xf32>
    %cst_17 = arith.constant dense<0.000000e+00> : vector<16x1xf32>
    %60 = tpu.matmul %58, %59, %cst_17 {dimension_numbers = #tpu.dot_dimension_numbers<[1], [0], [0], [1], [0, 0, 1, 1], [], []>} : vector<16x256xf32>, vector<256x1xf32>, vector<16x1xf32> -> vector<16x1xf32>
    %61 = vector.extract_strided_slice %60 {offsets = [0, 0], sizes = [8, 1], strides = [1, 1]} : vector<16x1xf32> to vector<8x1xf32>
    %cst_18 = arith.constant 3.906250e-03 : f32
    %62 = vector.broadcast %cst_18 : f32 to vector<8x1xf32>
    %63 = arith.mulf %61, %62 : vector<8x1xf32>
    %64 = vector.extract_strided_slice %60 {offsets = [8, 0], sizes = [8, 1], strides = [1, 1]} : vector<16x1xf32> to vector<8x1xf32>
    %cst_19 = arith.constant 3.906250e-03 : f32
    %65 = vector.broadcast %cst_19 : f32 to vector<8x1xf32>
    %66 = arith.mulf %64, %65 : vector<8x1xf32>
    %67 = arith.mulf %63, %63 : vector<8x1xf32>
    %68 = arith.subf %66, %67 : vector<8x1xf32>
    %cst_20 = arith.constant 0.000000e+00 : f32
    %69 = vector.broadcast %cst_20 : f32 to vector<8x1xf32>
    %70 = arith.maximumf %68, %69 : vector<8x1xf32>
    %cst_21 = arith.constant 9.99999974E-6 : f32
    %71 = vector.broadcast %cst_21 : f32 to vector<8x1xf32>
    %72 = arith.addf %70, %71 : vector<8x1xf32>
    %73 = math.rsqrt %72 : vector<8x1xf32>
    %74 = arith.mulf %63, %73 : vector<8x1xf32>
    %75 = vector.broadcast %73 : vector<8x1xf32> to vector<8x256xf32>
    %76 = arith.mulf %56, %75 : vector<8x256xf32>
    %77 = vector.broadcast %74 : vector<8x1xf32> to vector<8x256xf32>
    %78 = arith.subf %76, %77 : vector<8x256xf32>
    %cst_22 = arith.constant 0.000000e+00 : f32
    %79 = vector.broadcast %cst_22 : f32 to vector<8x256xf32>
    %80 = arith.maximumf %78, %79 : vector<8x256xf32>
    %81 = vector.extract_strided_slice %80 {offsets = [0, 224], sizes = [8, 32], strides = [1, 1]} : vector<8x256xf32> to vector<8x32xf32>
    %82 = vector.extract_strided_slice %80 {offsets = [0, 0], sizes = [8, 224], strides = [1, 1]} : vector<8x256xf32> to vector<8x224xf32>
    %83 = tpu.concatenate %81, %82 in 1 : vector<8x32xf32>, vector<8x224xf32> -> vector<8x256xf32>
    %c8 = arith.constant 8 : index
    %c0_23 = arith.constant 0 : index
    %84 = vector.load %arg2[%c8, %c0_23] : memref<16x256xf32, #tpu.memory_space<vmem>>, vector<1x256xf32>
    %85 = vector.broadcast %84 : vector<1x256xf32> to vector<8x256xf32>
    %86 = arith.mulf %83, %85 : vector<8x256xf32>
    %87 = vector.extract_strided_slice %80 {offsets = [0, 240], sizes = [8, 16], strides = [1, 1]} : vector<8x256xf32> to vector<8x16xf32>
    %88 = vector.extract_strided_slice %80 {offsets = [0, 0], sizes = [8, 240], strides = [1, 1]} : vector<8x256xf32> to vector<8x240xf32>
    %89 = tpu.concatenate %87, %88 in 1 : vector<8x16xf32>, vector<8x240xf32> -> vector<8x256xf32>
    %c1_24 = arith.constant 1 : index
    %c0_25 = arith.constant 0 : index
    %90 = vector.load %arg2[%c1_24, %c0_25] : memref<16x256xf32, #tpu.memory_space<vmem>>, vector<1x256xf32>
    %91 = vector.broadcast %90 : vector<1x256xf32> to vector<8x256xf32>
    %92 = arith.mulf %89, %91 : vector<8x256xf32>
    %93 = vector.extract_strided_slice %80 {offsets = [0, 16], sizes = [8, 240], strides = [1, 1]} : vector<8x256xf32> to vector<8x240xf32>
    %94 = vector.extract_strided_slice %80 {offsets = [0, 0], sizes = [8, 16], strides = [1, 1]} : vector<8x256xf32> to vector<8x16xf32>
    %95 = tpu.concatenate %93, %94 in 1 : vector<8x240xf32>, vector<8x16xf32> -> vector<8x256xf32>
    %c6_26 = arith.constant 6 : index
    %c0_27 = arith.constant 0 : index
    %96 = vector.load %arg2[%c6_26, %c0_27] : memref<16x256xf32, #tpu.memory_space<vmem>>, vector<1x256xf32>
    %97 = vector.broadcast %96 : vector<1x256xf32> to vector<8x256xf32>
    %98 = arith.mulf %95, %97 : vector<8x256xf32>
    %99 = vector.extract_strided_slice %80 {offsets = [0, 32], sizes = [8, 224], strides = [1, 1]} : vector<8x256xf32> to vector<8x224xf32>
    %100 = vector.extract_strided_slice %80 {offsets = [0, 0], sizes = [8, 32], strides = [1, 1]} : vector<8x256xf32> to vector<8x32xf32>
    %101 = tpu.concatenate %99, %100 in 1 : vector<8x224xf32>, vector<8x32xf32> -> vector<8x256xf32>
    %c9 = arith.constant 9 : index
    %c0_28 = arith.constant 0 : index
    %102 = vector.load %arg2[%c9, %c0_28] : memref<16x256xf32, #tpu.memory_space<vmem>>, vector<1x256xf32>
    %103 = vector.broadcast %102 : vector<1x256xf32> to vector<8x256xf32>
    %104 = arith.mulf %101, %103 : vector<8x256xf32>
    %105 = vector.extract_strided_slice %80 {offsets = [0, 254], sizes = [8, 2], strides = [1, 1]} : vector<8x256xf32> to vector<8x2xf32>
    %106 = vector.extract_strided_slice %80 {offsets = [0, 0], sizes = [8, 254], strides = [1, 1]} : vector<8x256xf32> to vector<8x254xf32>
    %107 = tpu.concatenate %105, %106 in 1 : vector<8x2xf32>, vector<8x254xf32> -> vector<8x256xf32>
    %c10 = arith.constant 10 : index
    %c0_29 = arith.constant 0 : index
    %108 = vector.load %arg2[%c10, %c0_29] : memref<16x256xf32, #tpu.memory_space<vmem>>, vector<1x256xf32>
    %109 = vector.broadcast %108 : vector<1x256xf32> to vector<8x256xf32>
    %110 = arith.mulf %107, %109 : vector<8x256xf32>
    %111 = vector.extract_strided_slice %80 {offsets = [0, 255], sizes = [8, 1], strides = [1, 1]} : vector<8x256xf32> to vector<8x1xf32>
    %112 = vector.extract_strided_slice %80 {offsets = [0, 0], sizes = [8, 255], strides = [1, 1]} : vector<8x256xf32> to vector<8x255xf32>
    %113 = tpu.concatenate %111, %112 in 1 : vector<8x1xf32>, vector<8x255xf32> -> vector<8x256xf32>
    %c3_30 = arith.constant 3 : index
    %c0_31 = arith.constant 0 : index
    %114 = vector.load %arg2[%c3_30, %c0_31] : memref<16x256xf32, #tpu.memory_space<vmem>>, vector<1x256xf32>
    %115 = vector.broadcast %114 : vector<1x256xf32> to vector<8x256xf32>
    %116 = arith.mulf %113, %115 : vector<8x256xf32>
    %117 = vector.extract_strided_slice %80 {offsets = [0, 1], sizes = [8, 255], strides = [1, 1]} : vector<8x256xf32> to vector<8x255xf32>
    %118 = vector.extract_strided_slice %80 {offsets = [0, 0], sizes = [8, 1], strides = [1, 1]} : vector<8x256xf32> to vector<8x1xf32>
    %119 = tpu.concatenate %117, %118 in 1 : vector<8x255xf32>, vector<8x1xf32> -> vector<8x256xf32>
    %c4_32 = arith.constant 4 : index
    %c0_33 = arith.constant 0 : index
    %120 = vector.load %arg2[%c4_32, %c0_33] : memref<16x256xf32, #tpu.memory_space<vmem>>, vector<1x256xf32>
    %121 = vector.broadcast %120 : vector<1x256xf32> to vector<8x256xf32>
    %122 = arith.mulf %119, %121 : vector<8x256xf32>
    %123 = vector.extract_strided_slice %80 {offsets = [0, 2], sizes = [8, 254], strides = [1, 1]} : vector<8x256xf32> to vector<8x254xf32>
    %124 = vector.extract_strided_slice %80 {offsets = [0, 0], sizes = [8, 2], strides = [1, 1]} : vector<8x256xf32> to vector<8x2xf32>
    %125 = tpu.concatenate %123, %124 in 1 : vector<8x254xf32>, vector<8x2xf32> -> vector<8x256xf32>
    %c11 = arith.constant 11 : index
    %c0_34 = arith.constant 0 : index
    %126 = vector.load %arg2[%c11, %c0_34] : memref<16x256xf32, #tpu.memory_space<vmem>>, vector<1x256xf32>
    %127 = vector.broadcast %126 : vector<1x256xf32> to vector<8x256xf32>
    %128 = arith.mulf %125, %127 : vector<8x256xf32>
    %129 = tpu.concatenate %86, %92, %80, %98, %104, %110, %116, %122, %128 in 0 : vector<8x256xf32>, vector<8x256xf32>, vector<8x256xf32>, vector<8x256xf32>, vector<8x256xf32>, vector<8x256xf32>, vector<8x256xf32>, vector<8x256xf32>, vector<8x256xf32> -> vector<72x256xf32>
    %c0_35 = arith.constant 0 : index
    %c0_36 = arith.constant 0 : index
    %130 = vector.load %arg7[%c0_35, %c0_36] : memref<8x72xbf16, #tpu.memory_space<vmem>>, vector<8x72xbf16>
    %131 = arith.truncf %129 : vector<72x256xf32> to vector<72x256xbf16>
    %cst_37 = arith.constant dense<0.000000e+00> : vector<8x256xf32>
    %132 = tpu.matmul %130, %131, %cst_37 {dimension_numbers = #tpu.dot_dimension_numbers<[1], [0], [0], [1], [0, 0, 1, 1], [], []>} : vector<8x72xbf16>, vector<72x256xbf16>, vector<8x256xf32> -> vector<8x256xf32>
    %c0_38 = arith.constant 0 : index
    %c0_39 = arith.constant 0 : index
    %133 = vector.load %arg8[%c0_38, %c0_39] : memref<8x1xf32, #tpu.memory_space<vmem>>, vector<8x1xf32>
    %134 = vector.broadcast %133 : vector<8x1xf32> to vector<8x256xf32>
    %135 = arith.addf %132, %134 : vector<8x256xf32>
    %cst_40 = arith.constant 0.000000e+00 : f32
    %136 = vector.broadcast %cst_40 : f32 to vector<8x256xf32>
    %137 = arith.maximumf %135, %136 : vector<8x256xf32>
    %c0_41 = arith.constant 0 : index
    %c0_42 = arith.constant 0 : index
    %138 = vector.load %arg9[%c0_41, %c0_42] : memref<8x8xbf16, #tpu.memory_space<vmem>>, vector<8x8xbf16>
    %139 = arith.truncf %137 : vector<8x256xf32> to vector<8x256xbf16>
    %cst_43 = arith.constant dense<0.000000e+00> : vector<8x256xf32>
    %140 = tpu.matmul %138, %139, %cst_43 {dimension_numbers = #tpu.dot_dimension_numbers<[1], [0], [0], [1], [0, 0, 1, 1], [], []>} : vector<8x8xbf16>, vector<8x256xbf16>, vector<8x256xf32> -> vector<8x256xf32>
    %c0_44 = arith.constant 0 : index
    %c0_45 = arith.constant 0 : index
    %141 = vector.load %arg10[%c0_44, %c0_45] : memref<8x1xf32, #tpu.memory_space<vmem>>, vector<8x1xf32>
    %142 = vector.broadcast %141 : vector<8x1xf32> to vector<8x256xf32>
    %143 = arith.addf %140, %142 : vector<8x256xf32>
    %144 = arith.mulf %143, %143 : vector<8x256xf32>
    %145 = tpu.concatenate %143, %144 in 0 : vector<8x256xf32>, vector<8x256xf32> -> vector<16x256xf32>
    %c0_46 = arith.constant 0 : index
    %c0_47 = arith.constant 0 : index
    %146 = vector.load %arg3[%c0_46, %c0_47] : memref<256x1xf32, #tpu.memory_space<vmem>>, vector<256x1xf32>
    %cst_48 = arith.constant dense<0.000000e+00> : vector<16x1xf32>
    %147 = tpu.matmul %145, %146, %cst_48 {dimension_numbers = #tpu.dot_dimension_numbers<[1], [0], [0], [1], [0, 0, 1, 1], [], []>} : vector<16x256xf32>, vector<256x1xf32>, vector<16x1xf32> -> vector<16x1xf32>
    %148 = vector.extract_strided_slice %147 {offsets = [0, 0], sizes = [8, 1], strides = [1, 1]} : vector<16x1xf32> to vector<8x1xf32>
    %cst_49 = arith.constant 3.906250e-03 : f32
    %149 = vector.broadcast %cst_49 : f32 to vector<8x1xf32>
    %150 = arith.mulf %148, %149 : vector<8x1xf32>
    %151 = vector.extract_strided_slice %147 {offsets = [8, 0], sizes = [8, 1], strides = [1, 1]} : vector<16x1xf32> to vector<8x1xf32>
    %cst_50 = arith.constant 3.906250e-03 : f32
    %152 = vector.broadcast %cst_50 : f32 to vector<8x1xf32>
    %153 = arith.mulf %151, %152 : vector<8x1xf32>
    %154 = arith.mulf %150, %150 : vector<8x1xf32>
    %155 = arith.subf %153, %154 : vector<8x1xf32>
    %cst_51 = arith.constant 0.000000e+00 : f32
    %156 = vector.broadcast %cst_51 : f32 to vector<8x1xf32>
    %157 = arith.maximumf %155, %156 : vector<8x1xf32>
    %cst_52 = arith.constant 9.99999974E-6 : f32
    %158 = vector.broadcast %cst_52 : f32 to vector<8x1xf32>
    %159 = arith.addf %157, %158 : vector<8x1xf32>
    %160 = math.rsqrt %159 : vector<8x1xf32>
    %161 = arith.mulf %150, %160 : vector<8x1xf32>
    %162 = vector.broadcast %160 : vector<8x1xf32> to vector<8x256xf32>
    %163 = arith.mulf %143, %162 : vector<8x256xf32>
    %164 = vector.broadcast %161 : vector<8x1xf32> to vector<8x256xf32>
    %165 = arith.subf %163, %164 : vector<8x256xf32>
    %166 = vector.extract_strided_slice %165 {offsets = [0, 239], sizes = [8, 17], strides = [1, 1]} : vector<8x256xf32> to vector<8x17xf32>
    %167 = vector.extract_strided_slice %165 {offsets = [0, 0], sizes = [8, 239], strides = [1, 1]} : vector<8x256xf32> to vector<8x239xf32>
    %168 = tpu.concatenate %166, %167 in 1 : vector<8x17xf32>, vector<8x239xf32> -> vector<8x256xf32>
    %c0_53 = arith.constant 0 : index
    %c0_54 = arith.constant 0 : index
    %169 = vector.load %arg2[%c0_53, %c0_54] : memref<16x256xf32, #tpu.memory_space<vmem>>, vector<1x256xf32>
    %170 = vector.broadcast %169 : vector<1x256xf32> to vector<8x256xf32>
    %171 = arith.mulf %168, %170 : vector<8x256xf32>
    %172 = vector.extract_strided_slice %165 {offsets = [0, 240], sizes = [8, 16], strides = [1, 1]} : vector<8x256xf32> to vector<8x16xf32>
    %173 = vector.extract_strided_slice %165 {offsets = [0, 0], sizes = [8, 240], strides = [1, 1]} : vector<8x256xf32> to vector<8x240xf32>
    %174 = tpu.concatenate %172, %173 in 1 : vector<8x16xf32>, vector<8x240xf32> -> vector<8x256xf32>
    %c1_55 = arith.constant 1 : index
    %c0_56 = arith.constant 0 : index
    %175 = vector.load %arg2[%c1_55, %c0_56] : memref<16x256xf32, #tpu.memory_space<vmem>>, vector<1x256xf32>
    %176 = vector.broadcast %175 : vector<1x256xf32> to vector<8x256xf32>
    %177 = arith.mulf %174, %176 : vector<8x256xf32>
    %178 = vector.extract_strided_slice %165 {offsets = [0, 241], sizes = [8, 15], strides = [1, 1]} : vector<8x256xf32> to vector<8x15xf32>
    %179 = vector.extract_strided_slice %165 {offsets = [0, 0], sizes = [8, 241], strides = [1, 1]} : vector<8x256xf32> to vector<8x241xf32>
    %180 = tpu.concatenate %178, %179 in 1 : vector<8x15xf32>, vector<8x241xf32> -> vector<8x256xf32>
    %c2_57 = arith.constant 2 : index
    %c0_58 = arith.constant 0 : index
    %181 = vector.load %arg2[%c2_57, %c0_58] : memref<16x256xf32, #tpu.memory_space<vmem>>, vector<1x256xf32>
    %182 = vector.broadcast %181 : vector<1x256xf32> to vector<8x256xf32>
    %183 = arith.mulf %180, %182 : vector<8x256xf32>
    %184 = vector.extract_strided_slice %165 {offsets = [0, 255], sizes = [8, 1], strides = [1, 1]} : vector<8x256xf32> to vector<8x1xf32>
    %185 = vector.extract_strided_slice %165 {offsets = [0, 0], sizes = [8, 255], strides = [1, 1]} : vector<8x256xf32> to vector<8x255xf32>
    %186 = tpu.concatenate %184, %185 in 1 : vector<8x1xf32>, vector<8x255xf32> -> vector<8x256xf32>
    %c3_59 = arith.constant 3 : index
    %c0_60 = arith.constant 0 : index
    %187 = vector.load %arg2[%c3_59, %c0_60] : memref<16x256xf32, #tpu.memory_space<vmem>>, vector<1x256xf32>
    %188 = vector.broadcast %187 : vector<1x256xf32> to vector<8x256xf32>
    %189 = arith.mulf %186, %188 : vector<8x256xf32>
    %190 = vector.extract_strided_slice %165 {offsets = [0, 1], sizes = [8, 255], strides = [1, 1]} : vector<8x256xf32> to vector<8x255xf32>
    %191 = vector.extract_strided_slice %165 {offsets = [0, 0], sizes = [8, 1], strides = [1, 1]} : vector<8x256xf32> to vector<8x1xf32>
    %192 = tpu.concatenate %190, %191 in 1 : vector<8x255xf32>, vector<8x1xf32> -> vector<8x256xf32>
    %c4_61 = arith.constant 4 : index
    %c0_62 = arith.constant 0 : index
    %193 = vector.load %arg2[%c4_61, %c0_62] : memref<16x256xf32, #tpu.memory_space<vmem>>, vector<1x256xf32>
    %194 = vector.broadcast %193 : vector<1x256xf32> to vector<8x256xf32>
    %195 = arith.mulf %192, %194 : vector<8x256xf32>
    %196 = vector.extract_strided_slice %165 {offsets = [0, 15], sizes = [8, 241], strides = [1, 1]} : vector<8x256xf32> to vector<8x241xf32>
    %197 = vector.extract_strided_slice %165 {offsets = [0, 0], sizes = [8, 15], strides = [1, 1]} : vector<8x256xf32> to vector<8x15xf32>
    %198 = tpu.concatenate %196, %197 in 1 : vector<8x241xf32>, vector<8x15xf32> -> vector<8x256xf32>
    %c5_63 = arith.constant 5 : index
    %c0_64 = arith.constant 0 : index
    %199 = vector.load %arg2[%c5_63, %c0_64] : memref<16x256xf32, #tpu.memory_space<vmem>>, vector<1x256xf32>
    %200 = vector.broadcast %199 : vector<1x256xf32> to vector<8x256xf32>
    %201 = arith.mulf %198, %200 : vector<8x256xf32>
    %202 = vector.extract_strided_slice %165 {offsets = [0, 16], sizes = [8, 240], strides = [1, 1]} : vector<8x256xf32> to vector<8x240xf32>
    %203 = vector.extract_strided_slice %165 {offsets = [0, 0], sizes = [8, 16], strides = [1, 1]} : vector<8x256xf32> to vector<8x16xf32>
    %204 = tpu.concatenate %202, %203 in 1 : vector<8x240xf32>, vector<8x16xf32> -> vector<8x256xf32>
    %c6_65 = arith.constant 6 : index
    %c0_66 = arith.constant 0 : index
    %205 = vector.load %arg2[%c6_65, %c0_66] : memref<16x256xf32, #tpu.memory_space<vmem>>, vector<1x256xf32>
    %206 = vector.broadcast %205 : vector<1x256xf32> to vector<8x256xf32>
    %207 = arith.mulf %204, %206 : vector<8x256xf32>
    %208 = vector.extract_strided_slice %165 {offsets = [0, 17], sizes = [8, 239], strides = [1, 1]} : vector<8x256xf32> to vector<8x239xf32>
    %209 = vector.extract_strided_slice %165 {offsets = [0, 0], sizes = [8, 17], strides = [1, 1]} : vector<8x256xf32> to vector<8x17xf32>
    %210 = tpu.concatenate %208, %209 in 1 : vector<8x239xf32>, vector<8x17xf32> -> vector<8x256xf32>
    %c7_67 = arith.constant 7 : index
    %c0_68 = arith.constant 0 : index
    %211 = vector.load %arg2[%c7_67, %c0_68] : memref<16x256xf32, #tpu.memory_space<vmem>>, vector<1x256xf32>
    %212 = vector.broadcast %211 : vector<1x256xf32> to vector<8x256xf32>
    %213 = arith.mulf %210, %212 : vector<8x256xf32>
    %214 = tpu.concatenate %171, %177, %183, %189, %165, %195, %201, %207, %213 in 0 : vector<8x256xf32>, vector<8x256xf32>, vector<8x256xf32>, vector<8x256xf32>, vector<8x256xf32>, vector<8x256xf32>, vector<8x256xf32>, vector<8x256xf32>, vector<8x256xf32> -> vector<72x256xf32>
    %c0_69 = arith.constant 0 : index
    %c0_70 = arith.constant 0 : index
    %215 = vector.load %arg11[%c0_69, %c0_70] : memref<8x72xbf16, #tpu.memory_space<vmem>>, vector<8x72xbf16>
    %216 = arith.truncf %214 : vector<72x256xf32> to vector<72x256xbf16>
    %cst_71 = arith.constant dense<0.000000e+00> : vector<8x256xf32>
    %217 = tpu.matmul %215, %216, %cst_71 {dimension_numbers = #tpu.dot_dimension_numbers<[1], [0], [0], [1], [0, 0, 1, 1], [], []>} : vector<8x72xbf16>, vector<72x256xbf16>, vector<8x256xf32> -> vector<8x256xf32>
    %c0_72 = arith.constant 0 : index
    %c0_73 = arith.constant 0 : index
    %218 = vector.load %arg12[%c0_72, %c0_73] : memref<8x1xf32, #tpu.memory_space<vmem>>, vector<8x1xf32>
    %219 = vector.broadcast %218 : vector<8x1xf32> to vector<8x256xf32>
    %220 = arith.addf %217, %219 : vector<8x256xf32>
    %221 = arith.mulf %220, %220 : vector<8x256xf32>
    %222 = tpu.concatenate %220, %221 in 0 : vector<8x256xf32>, vector<8x256xf32> -> vector<16x256xf32>
    %c0_74 = arith.constant 0 : index
    %c0_75 = arith.constant 0 : index
    %223 = vector.load %arg3[%c0_74, %c0_75] : memref<256x1xf32, #tpu.memory_space<vmem>>, vector<256x1xf32>
    %cst_76 = arith.constant dense<0.000000e+00> : vector<16x1xf32>
    %224 = tpu.matmul %222, %223, %cst_76 {dimension_numbers = #tpu.dot_dimension_numbers<[1], [0], [0], [1], [0, 0, 1, 1], [], []>} : vector<16x256xf32>, vector<256x1xf32>, vector<16x1xf32> -> vector<16x1xf32>
    %225 = vector.extract_strided_slice %224 {offsets = [0, 0], sizes = [8, 1], strides = [1, 1]} : vector<16x1xf32> to vector<8x1xf32>
    %cst_77 = arith.constant 3.906250e-03 : f32
    %226 = vector.broadcast %cst_77 : f32 to vector<8x1xf32>
    %227 = arith.mulf %225, %226 : vector<8x1xf32>
    %228 = vector.extract_strided_slice %224 {offsets = [8, 0], sizes = [8, 1], strides = [1, 1]} : vector<16x1xf32> to vector<8x1xf32>
    %cst_78 = arith.constant 3.906250e-03 : f32
    %229 = vector.broadcast %cst_78 : f32 to vector<8x1xf32>
    %230 = arith.mulf %228, %229 : vector<8x1xf32>
    %231 = arith.mulf %227, %227 : vector<8x1xf32>
    %232 = arith.subf %230, %231 : vector<8x1xf32>
    %cst_79 = arith.constant 0.000000e+00 : f32
    %233 = vector.broadcast %cst_79 : f32 to vector<8x1xf32>
    %234 = arith.maximumf %232, %233 : vector<8x1xf32>
    %cst_80 = arith.constant 9.99999974E-6 : f32
    %235 = vector.broadcast %cst_80 : f32 to vector<8x1xf32>
    %236 = arith.addf %234, %235 : vector<8x1xf32>
    %237 = math.rsqrt %236 : vector<8x1xf32>
    %238 = arith.mulf %227, %237 : vector<8x1xf32>
    %239 = vector.broadcast %237 : vector<8x1xf32> to vector<8x256xf32>
    %240 = arith.mulf %220, %239 : vector<8x256xf32>
    %241 = vector.broadcast %238 : vector<8x1xf32> to vector<8x256xf32>
    %242 = arith.subf %240, %241 : vector<8x256xf32>
    %243 = arith.addf %1, %242 : vector<8x256xf32>
    %c0_81 = arith.constant 0 : index
    %c0_82 = arith.constant 0 : index
    %c0_83 = arith.constant 0 : index
    %244 = vector.load %arg13[%c0_81, %c0_82, %c0_83] : memref<1x8x256xf32, #tpu.memory_space<vmem>>, vector<1x8x256xf32>
    %245 = vector.shape_cast %244 : vector<1x8x256xf32> to vector<8x256xf32>
    %246 = vector.shape_cast %243 : vector<8x256xf32> to vector<1x8x256xf32>
    tpu.vector_store %arg13[%c0_81, %c0_82, %c0_83], %246 {strides = array<i32>} : memref<1x8x256xf32, #tpu.memory_space<vmem>>, vector<1x8x256xf32>,
    return
  }
  func.func @transform_0(%arg0: i32) -> (i32, i32, i32) {
    %c0_i32 = arith.constant 0 : i32
    %c0_i32_0 = arith.constant 0 : i32
    %c0_i32_1 = arith.constant 0 : i32
    return %arg0, %c0_i32, %c0_i32_0 : i32, i32, i32
  }
  func.func @transform_1(%arg0: i32) -> (i32, i32) {
    %c0_i32 = arith.constant 0 : i32
    %c0_i32_0 = arith.constant 0 : i32
    %c0_i32_1 = arith.constant 0 : i32
    return %c0_i32, %c0_i32_0 : i32, i32
  }
  func.func @transform_2(%arg0: i32) -> (i32, i32) {
    %c0_i32 = arith.constant 0 : i32
    %c0_i32_0 = arith.constant 0 : i32
    %c0_i32_1 = arith.constant 0 : i32
    return %c0_i32, %c0_i32_0 : i32, i32
  }
  func.func @transform_3(%arg0: i32) -> (i32, i32) {
    %c0_i32 = arith.constant 0 : i32
    %c0_i32_0 = arith.constant 0 : i32
    %c0_i32_1 = arith.constant 0 : i32
    return %c0_i32, %c0_i32_0 : i32, i32
  }
  func.func @transform_4(%arg0: i32) -> (i32, i32) {
    %c0_i32 = arith.constant 0 : i32
    %c0_i32_0 = arith.constant 0 : i32
    %c0_i32_1 = arith.constant 0 : i32
    return %c0_i32, %c0_i32_0 : i32, i32
  }
  func.func @transform_5(%arg0: i32) -> (i32, i32) {
    %c0_i32 = arith.constant 0 : i32
    %c0_i32_0 = arith.constant 0 : i32
    %c0_i32_1 = arith.constant 0 : i32
    return %c0_i32, %c0_i32_0 : i32, i32
  }
  func.func @transform_6(%arg0: i32) -> (i32, i32) {
    %c0_i32 = arith.constant 0 : i32
    %c0_i32_0 = arith.constant 0 : i32
    %c0_i32_1 = arith.constant 0 : i32
    return %c0_i32, %c0_i32_0 : i32, i32
  }
  func.func @transform_7(%arg0: i32) -> (i32, i32) {
    %c0_i32 = arith.constant 0 : i32
    %c0_i32_0 = arith.constant 0 : i32
    %c0_i32_1 = arith.constant 0 : i32
    return %c0_i32, %c0_i32_0 : i32, i32
  }
  func.func @transform_8(%arg0: i32) -> (i32, i32) {
    %c0_i32 = arith.constant 0 : i32
    %c0_i32_0 = arith.constant 0 : i32
    %c0_i32_1 = arith.constant 0 : i32
    return %c0_i32, %c0_i32_0 : i32, i32
  }
  func.func @transform_9(%arg0: i32) -> (i32, i32) {
    %c0_i32 = arith.constant 0 : i32
    %c0_i32_0 = arith.constant 0 : i32
    %c0_i32_1 = arith.constant 0 : i32
    return %c0_i32, %c0_i32_0 : i32, i32
  }
  func.func @transform_10(%arg0: i32) -> (i32, i32) {
    %c0_i32 = arith.constant 0 : i32
    %c0_i32_0 = arith.constant 0 : i32
    %c0_i32_1 = arith.constant 0 : i32
    return %c0_i32, %c0_i32_0 : i32, i32
  }
  func.func @transform_11(%arg0: i32) -> (i32, i32) {
    %c0_i32 = arith.constant 0 : i32
    %c0_i32_0 = arith.constant 0 : i32
    %c0_i32_1 = arith.constant 0 : i32
    return %c0_i32, %c0_i32_0 : i32, i32
  }
  func.func @transform_12(%arg0: i32) -> (i32, i32, i32) {
    %c0_i32 = arith.constant 0 : i32
    %c0_i32_0 = arith.constant 0 : i32
    %c0_i32_1 = arith.constant 0 : i32
    return %arg0, %c0_i32, %c0_i32_0 : i32, i32, i32
  }
}

</mosaic_0001>

<bundles_post_ra>
// kernel: tpu_custom_call.1
= control target key start
LH: loop header
LB: loop body
LE: loop exit
PB: predicated region body
PF: predicated region fallthrough
CT: control target
= control target key end

     0   :  { %s2207_s0 = inlined_call_operand.vmem [shape: f32[2,8,256], index: 0, kind: input, shape index: {}]   ;;  %s2208_s1 = inlined_call_operand.vmem [shape: f32[16,256], index: 1, kind: input, shape index: {}]   ;;  %s2209_s2 = inlined_call_operand.vmem [shape: f32[256,1], index: 2, kind: input, shape index: {}]   ;;  %s2210_s3 = inlined_call_operand.vmem [shape: f32[1,256], index: 3, kind: input, shape index: {}]   ;;  %s2211_s4 = inlined_call_operand.vmem [shape: bf16[8,72], index: 4, kind: input, shape index: {}]   ;;  %s2212_s5 = inlined_call_operand.vmem [shape: f32[8,1], index: 5, kind: input, shape index: {}]   ;;  %s2213_s6 = inlined_call_operand.vmem [shape: bf16[8,72], index: 6, kind: input, shape index: {}]   ;;  %s2214_s7 = inlined_call_operand.vmem [shape: f32[8,1], index: 7, kind: input, shape index: {}]   ;;  %s2215_s8 = inlined_call_operand.vmem [shape: bf16[8,8], index: 8, kind: input, shape index: {}]   ;;  %s2216_s9 = inlined_call_operand.vmem [shape: f32[8,1], index: 9, kind: input, shape index: {}]   ;;  %s2217_s10 = inlined_call_operand.vmem [shape: bf16[8,72], index: 10, kind: input, shape index: {}]   ;;  %s2218_s11 = inlined_call_operand.vmem [shape: f32[8,1], index: 11, kind: input, shape index: {}]   ;;  %s2219_s12 = inlined_call_operand.hbm [shape: f32[2,8,256], index: 12, kind: output, shape index: {}]  }
   0x1   :  { %2256 = sst [smem:[#allocation13_spill]] %s2207_s0 }
   0x2   :  { %2257 = sst [smem:[#allocation14_spill]] %s2208_s1 }
   0x3   :  { %17 = vsyncpa [#allocation3], 0 }
   0x4   :  { %19 = vsyncpa [#allocation3 + $0x1], 0  ;;  %s1574_s20 = smov 0   ;;  %s1576_s21 = smov 0  }
   0x5   :  { %s1578_s22 = smov 0   ;;  %s1580_s23 = smov 0  }
   0x6 LB: > { %s1595_s24 = sadd.s32 4294967295, %s1494_s23   ;;  %s1336_s25 = sadd.s32 4294967294, %s1494_s23   ;;  %s1494_s23 = sphi %s1580_s23, %s2297_s23   ;;  %s1490_s22 = sphi %s1578_s22, %s2296_s22   ;;  %s1486_s21 = sphi %s1576_s21, %s2295_s21   ;;  %s1482_s20 = sphi %s1574_s20, %s2294_s20  }
   0x7   : > { %s1599_s26 = sadd.s32 1, %s1494_s23   ;;  %s289_s27 = sadd.s32 1, %s1490_s22 }
   0x8   : > { %s286_s28 = ssub.s32 %s1494_s23, %s1599_s26  ;;  %p299_p0 = scmp.ne.s32.totalorder %s1490_s22, %s1486_s21 }
   0x9   : > { %p287_p1 = scmp.eq.s32.totalorder %s286_s28, 0  ;;  %p300_p2 = scmp.eq.s32.totalorder %s1595_s24, 1 }
   0xa   : > { %p305_p3 = scmp.ne.s32.totalorder %s1486_s21, %s1482_s20  ;;  %p306_p4 = scmp.eq.s32.totalorder %s1336_s25, 1 }
   0xb   : > { %s1610_s29 = scalar_select %p287_p1, %s1490_s22, %s289_s27  }
   0xc   : > { %p1612_p5 = por %p300_p2, %p299_p0  ;;  %p1616_p6 = por %p306_p4, %p305_p3 }
   0xd   : > { %p1339_p7 = scmp.ge.s32.totalorder %s1494_s23, 1  ;;  %p365_p8 = scmp.lt.s32.totalorder %s1494_s23, 3 }
   0xf   : > { %p366_p9 = pnand %p1339_p7, %p365_p8 }
  0x11   : > { %369 = sbr.rel (%p366_p9) target bundleno = 1910 (0x776), region = 68 }
  0x16   : > { %p407_p10 = scmp.lt.s32.totalorder %s1595_s24, 1  ;;  %s2260_s0 = sld [smem:[#allocation13_spill]]  ;;  %vm534_vm0 = vcmask 916480   ;;  %vm515_vm1 = vcmask 924672   ;;  %vm553_vm2 = vcmask 908288   ;;  %vm589_vm3 = vcmask 1043456  }
  0x17   : > { %s2222_s18 = smov 113   ;;  %s2224_s19 = smov 111   ;;  %vm496_vm4 = vcmask 1039360   ;;  %v579_v43 = vld [vmem:[%s2212_s5] sm:$0xff]  ;;  %v1721_v44 = vld [vmem:[%s2209_s2 + $0x78] sm:$0xff]  ;;  %v1504_v49 = vmov 0  }
  0x18   : > { %s408_s14 = scalar_select %p407_p10, %s1595_s24, 1  ;;  %v1726_v45 = vld [vmem:[%s2209_s2 + $0xf8] sm:$0xff]  ;;  %1421 = vset.pattern.permute.xlu1 %v1504_v49  ;;  %656 = vmatpush.msra.mxu2 %v1721_v44  ;;  %v1737_v50 = vld [vmem:[%s2209_s2 + $0x70] sm:$0xff]  ;;  %vm478_vm5 = vcmask 7168   ;;  %v1758_v56 = vld [vmem:[%s2209_s2 + $0x68] sm:$0xff]  ;;  %vm459_vm6 = vcmask 121856  }
  0x19   : > { %s2228_s25 = smov 112   ;;  %s2244_s27 = smov 127   ;;  %v1747_v52 = vld [vmem:[%s2209_s2 + $0xf0] sm:$0xff]  ;;  %679 = vmatpush.msra.mxu3 %v1726_v45  ;;  %v1763_v57 = vld [vmem:[%s2209_s2 + $0xe8] sm:$0xff]  ;;  %1422 = vset.pattern.permute.xlu2 %v1504_v49  ;;  %v1773_v62 = vld [vmem:[%s2209_s2 + $0x60] sm:$0xff]  ;;  %vm422_vm7 = vcmask 138240  }
  0x1a   : > { %s1367_s15 = sshll.u32 %s408_s14, 4  ;;  %s2220_s28 = smov 15   ;;  %657 = vmatpush.msra.mxu2 %v1737_v50  ;;  %1423 = vset.pattern.permute.xlu0 %v1504_v49  ;;  %vm440_vm8 = vcmask 130048   ;;  %vm585_vm9 = vcmask 588800   ;;  %vm842_vm13 = vcmask 1031168   ;;  %vm782_vm14 = vcmask 785408  }
  0x1b   : > { %s2232_s14 = smov 1   ;;  %s2230_s3 = smov 16   ;;  %680 = vmatpush.msra.mxu3 %v1747_v52  ;;  %vm802_vm15 = vcmask 15360  }
  0x1c   : > { %s1627_s17 = scalar_lea.vmem %s2260_s0, %s1367_s15  ;;  %s2226_s15 = smov 17   ;;  %658 = vmatpush.msra.mxu2 %v1758_v56 }
  0x1d   : > { %v1630_v0 = vld [vmem:[%s1627_s17] sm:$0xff]  ;;  %v1639_v1 = vld [vmem:[%s1627_s17 + $0x8] sm:$0xff]  ;;  %s2261_s1 = sld [smem:[#allocation14_spill]]  ;;  %681 = vmatpush.msra.mxu3 %v1763_v57  ;;  %s2277_s16 = smov 17  }
  0x1e   : > { %511 = vrot.lane.b32.xlu1 %v1630_v0, %s2222_s18  ;;  %549 = vrot.lane.b32.xlu0 %v1630_v0, %s2224_s19 }
  0x1f   : > { %530 = vrot.lane.b32.xlu2 %v1630_v0, %s2228_s25  ;;  %659 = vmatpush.msra.mxu2 %v1773_v62 }
  0x23   : > { %v1670_v6 = vld [vmem:[%s2261_s1 + $0x7] ss:$8 sm:$0x3]  ;;  %v1348_v7 = vld [vmem:[%s2261_s1 + $0x6] ss:$8 sm:$0x3] }
  0x24   : > { %2262 = vst [vmem:[#allocation5_spill] sm:$0xff] %v1670_v6  ;;  %v1678_v8 = vld [vmem:[%s2261_s1 + $0x5] ss:$8 sm:$0x3]  ;;  %v2241_v9 = vperm.slane %v1670_v6, 0  ;;  %v2240_v10 = vperm.slane %v1670_v6, 1 }
  0x25   : > { %2263 = vst [vmem:[#allocation6_spill] sm:$0xff] %v1678_v8  ;;  %v1682_v11 = vperm.slane %v1348_v7, 0  ;;  %v1684_v12 = vperm.slane %v1348_v7, 1  ;;  %v2239_v13 = vperm.slane %v1678_v8, 0  ;;  %v2238_v14 = vperm.slane %v1678_v8, 1  ;;  %v1789_v7 = vld [vmem:[%s2209_s2 + $0x58] sm:$0xff] }
  0x26   : > { %513 = vrot.lane.b32.xlu1 %v1639_v1, %s2222_s18  ;;  %551 = vrot.lane.b32.xlu0 %v1639_v1, %s2224_s19  ;;  %v1346_v25 = vld [vmem:[%s2261_s1 + $0x4] ss:$8 sm:$0x3]  ;;  %v1345_v48 = vld [vmem:[%s2261_s1 + $0x3] ss:$8 sm:$0x3] }
  0x27   : > { %532 = vrot.lane.b32.xlu2 %v1639_v1, %s2228_s25  ;;  %v1709_v35 = vperm.slane %v1346_v25, 0  ;;  %v1711_v36 = vperm.slane %v1346_v25, 1  ;;  %v1742_v51 = vld [vmem:[%s2261_s1 + $0x2] ss:$8 sm:$0x3]  ;;  %v1752_v55 = vperm.slane %v1345_v48, 0  ;;  %660 = vmatpush.msra.mxu2 %v1789_v7 }
  0x28   : > { %2266 = vst [vmem:[#allocation9_spill] sm:$0xff] %v1742_v51  ;;  %v1765_v59 = vperm.slane %v1345_v48, 1  ;;  %v2237_v60 = vperm.slane %v1742_v51, 0  ;;  %v2236_v61 = vperm.slane %v1742_v51, 1  ;;  %v1824_v25 = vld [vmem:[%s2209_s2 + $0xc8] sm:$0xff]  ;;  %s1505_s18 = smov 126  }
  0x29   : > { %2264 = vst [vmem:[#allocation7_spill] sm:$0xff] %v1709_v35  ;;  %s1506_s19 = smov 96   ;;  %s1507_s25 = smov 32  }
  0x2a   : > { %2265 = vst [vmem:[#allocation8_spill] sm:$0xff] %v1711_v36 }
  0x2b   : > { %2267 = vst [vmem:[#allocation10_spill] sm:$0xff] %v1752_v55 }
  0x2c   : > { %2268 = vst [vmem:[#allocation11_spill] sm:$0xff] %v1765_v59 }
  0x2e   : > { %494 = vrot.lane.b32.xlu1 %v1639_v1, %s2244_s27  ;;  %492 = vrot.lane.b32.xlu0 %v1630_v0, %s2244_s27 }
  0x2f   : > { %454 = vrot.lane.b32.xlu2 %v1639_v1, %s2220_s28 }
  0x36   : > { %473 = vrot.lane.b32.xlu1 %v1639_v1, %s2232_s14  ;;  %457 = vrot.lane.b32.xlu0 %v1630_v0, %s2220_s28  ;;  %s1508_s28 = smov 2  }
  0x37   : > { %476 = vrot.lane.b32.xlu2 %v1630_v0, %s2232_s14  ;;  %s2270_s14 = smov 1  }
  0x3e   : > { %420 = vrot.lane.b32.xlu1 %v1630_v0, %s2226_s15  ;;  %416 = vrot.lane.b32.xlu0 %v1639_v1, %s2226_s15  ;;  %s2274_s15 = smov 113  }
  0x3f   : > { %435 = vrot.lane.b32.xlu2 %v1639_v1, %s2230_s3 }
  0x46   : > { %438 = vrot.lane.b32.xlu0 %v1630_v0, %s2230_s3  ;;  %582 = vperm.xlu1 %1421, %v579_v43   ;;  %v1881_v43 = vld [vmem:[%s2209_s2 + $0x28] sm:$0xff]  ;;  %s2271_s3 = smov 112  }
  0x79   : > { %v531_v2 = vpop.permute.xlu2 %530 }
  0x81   : > { %v533_v5 = vpop.permute.xlu2 %532 }
  0x82   : > { %v535_v17 = vsel %vm534_vm0, %v531_v2, %v533_v5  ;;  %v539_v21 = vsel %vm534_vm0, %v533_v5, %v531_v2 }
  0x83   : > { %v547_v26 = vmul.f32 %v1682_v11, %v535_v17  ;;  %v548_v31 = vmul.f32 %v1684_v12, %v539_v21 }
  0x89   : > { %v455_v30 = vpop.permute.xlu2 %454 }
  0x90   : > { %v512_v3 = vpop.permute.xlu1 %511  ;;  %v550_v4 = vpop.permute.xlu0 %549 }
  0x91   : > { %v477_v58 = vpop.permute.xlu2 %476 }
  0x98   : > { %v514_v15 = vpop.permute.xlu1 %513  ;;  %v552_v16 = vpop.permute.xlu0 %551 }
  0x99   : > { %v516_v18 = vsel %vm515_vm1, %v512_v3, %v514_v15  ;;  %v554_v19 = vsel %vm553_vm2, %v550_v4, %v552_v16  ;;  %v558_v20 = vsel %vm553_vm2, %v552_v16, %v550_v4  ;;  %v520_v22 = vsel %vm515_vm1, %v514_v15, %v512_v3 }
  0x9a   : > { %v566_v23 = vmul.f32 %v2241_v9, %v554_v19  ;;  %v567_v24 = vmul.f32 %v2240_v10, %v558_v20  ;;  %v528_v27 = vmul.f32 %v2239_v13, %v516_v18  ;;  %v529_v32 = vmul.f32 %v2238_v14, %v520_v22  ;;  %v1801_v19 = vld [vmem:[%s2209_s2 + $0xd8] sm:$0xff]  ;;  %v1808_v22 = vld [vmem:[%s2209_s2 + $0x50] sm:$0xff] }
  0x9b   : > { %661 = vmatpush.msra.mxu2 %v1808_v22 }
  0x9c   : > { %v577_v28 = vpack.c.bf16 %v566_v23, %v566_v23  ;;  %v578_v29 = vpack.c.bf16 %v567_v24, %v567_v24  ;;  %v575_v39 = vpack.c.bf16 %v547_v26, %v528_v27  ;;  %v576_v42 = vpack.c.bf16 %v548_v31, %v529_v32  ;;  %v1813_v23 = vld [vmem:[%s2209_s2 + $0xd0] sm:$0xff]  ;;  %v1819_v24 = vld [vmem:[%s2209_s2 + $0x48] sm:$0xff]  ;;  %v1831_v27 = vld [vmem:[%s2209_s2 + $0x40] sm:$0xff] }
  0x9d   : > { %662 = vmatpush.msra.mxu2 %v1819_v24  ;;  %v1853_v31 = vld [vmem:[%s2209_s2 + $0xb8] sm:$0xff]  ;;  %v1343_v32 = vld [vmem:[%s2261_s1 + $0x1] ss:$8 sm:$0x3] }
  0x9e   : > { %v591_v33 = vsel %vm589_vm3, %v577_v28, 0  ;;  %v594_v34 = vsel %vm589_vm3, %v578_v29, 0  ;;  %v1836_v28 = vld [vmem:[%s2209_s2 + $0xc0] sm:$0xff] }
  0x9f   : > { %599 = vmatpush.bf16.msra.mxu0 %v591_v33  ;;  %612 = vmatpush.bf16.msra.mxu1 %v594_v34  ;;  %v1843_v29 = vld [vmem:[%s2261_s1] ss:$8 sm:$0x3]  ;;  %v1863_v34 = vld [vmem:[%s2209_s2 + $0x30] sm:$0xff] }
  0xa0   : > { %v495_v37 = vpop.permute.xlu1 %494  ;;  %v493_v38 = vpop.permute.xlu0 %492  ;;  %2269 = vst [vmem:[#allocation12_spill] sm:$0xff] %v1843_v29  ;;  %663 = vmatpush.msra.mxu2 %v1831_v27 }
  0xa1   : > { %v497_v40 = vsel %vm496_vm4, %v493_v38, %v495_v37  ;;  %v501_v41 = vsel %vm496_vm4, %v495_v37, %v493_v38  ;;  %v1868_v37 = vld [vmem:[%s2209_s2 + $0xb0] sm:$0xff]  ;;  %v2235_v38 = vperm.slane %v1843_v29, 0 }
  0xa2   : > { %v509_v46 = vmul.f32 %v1709_v35, %v497_v40  ;;  %v510_v47 = vmul.f32 %v1711_v36, %v501_v41  ;;  %v436_v40 = vpop.permute.xlu2 %435  ;;  %v1874_v41 = vperm.slane %v1343_v32, 0 }
  0xa3   : > { %600 = vmatpush.bf16.msra.mxu0 %v575_v39  ;;  %613 = vmatpush.bf16.msra.mxu1 %v576_v42  ;;  %v2234_v39 = vperm.slane %v1843_v29, 1  ;;  %v1876_v42 = vperm.slane %v1343_v32, 1  ;;  %v1949_v32 = vld [vmem:[%s2209_s2 + $0x88] sm:$0xff] }
  0xa4   : > { %v573_v53 = vpack.c.bf16 %v509_v46, %v1630_v0  ;;  %v574_v54 = vpack.c.bf16 %v510_v47, %v1639_v1  ;;  %v1780_v1 = vld [vmem:[%s2209_s2 + $0xe0] sm:$0xff]  ;;  %v1886_v46 = vld [vmem:[%s2209_s2 + $0xa8] sm:$0xff] }
  0xa5   : > { %682 = vmatpush.msra.mxu3 %v1780_v1 }
  0xa7   : > { %601 = vmatpush.bf16.msra.mxu0 %v573_v53  ;;  %614 = vmatpush.bf16.msra.mxu1 %v574_v54  ;;  %v1895_v53 = vld [vmem:[%s2209_s2 + $0x20] sm:$0xff] }
  0xa8   : > { %v474_v63 = vpop.permute.xlu1 %473  ;;  %v458_v0 = vpop.permute.xlu0 %457  ;;  %683 = vmatpush.msra.mxu3 %v1801_v19  ;;  %v1900_v54 = vld [vmem:[%s2209_s2 + $0xa0] sm:$0xff] }
  0xa9   : > { %v479_v2 = vsel %vm478_vm5, %v477_v58, %v474_v63  ;;  %v482_v3 = vsel %vm478_vm5, %v474_v63, %v477_v58  ;;  %v460_v4 = vsel %vm459_vm6, %v458_v0, %v455_v30  ;;  %v463_v5 = vsel %vm459_vm6, %v455_v30, %v458_v0  ;;  %v1848_v30 = vld [vmem:[%s2209_s2 + $0x38] sm:$0xff] }
  0xaa   : > { %v490_v15 = vmul.f32 %v1752_v55, %v482_v3  ;;  %v491_v16 = vmul.f32 %v1765_v59, %v479_v2  ;;  %v471_v17 = vmul.f32 %v2237_v60, %v463_v5  ;;  %v472_v18 = vmul.f32 %v2236_v61, %v460_v4  ;;  %684 = vmatpush.msra.mxu3 %v1813_v23  ;;  %v1915_v5 = vld [vmem:[%s2209_s2 + $0x18] sm:$0xff] }
  0xab   : > { %664 = vmatpush.msra.mxu2 %v1848_v30 }
  0xac   : > { %v571_v20 = vpack.c.bf16 %v490_v15, %v471_v17  ;;  %v572_v21 = vpack.c.bf16 %v491_v16, %v472_v18  ;;  %685 = vmatpush.msra.mxu3 %v1824_v25  ;;  %v1920_v15 = vld [vmem:[%s2209_s2 + $0x98] sm:$0xff]  ;;  %v1927_v18 = vld [vmem:[%s2209_s2 + $0x10] sm:$0xff] }
  0xad   : > { %665 = vmatpush.msra.mxu2 %v1863_v34 }
  0xae   : > { %602 = vmatpush.bf16.msra.mxu0 %v571_v20  ;;  %615 = vmatpush.bf16.msra.mxu1 %v572_v21  ;;  %v1932_v20 = vld [vmem:[%s2209_s2 + $0x90] sm:$0xff]  ;;  %v568_v21 = vld [vmem:[%s2211_s4] sm:$0xf] }
  0xaf   : > { %686 = vmatpush.msra.mxu3 %v1836_v28  ;;  %666 = vmatpush.msra.mxu2 %v1881_v43 }
  0xb0   : > { %v417_v26 = vpop.permute.xlu0 %416  ;;  %v421_v33 = vpop.permute.xlu1 %420 }
  0xb1   : > { %687 = vmatpush.msra.mxu3 %v1853_v31  ;;  %v423_v47 = vsel %vm422_vm7, %v421_v33, %v417_v26  ;;  %v426_v48 = vsel %vm422_vm7, %v417_v26, %v421_v33  ;;  %667 = vmatpush.msra.mxu2 %v1895_v53  ;;  %v1944_v26 = vld [vmem:[%s2209_s2 + $0x8] sm:$0xff]  ;;  %v1958_v33 = vld [vmem:[%s2209_s2] sm:$0xff] }
  0xb2   : > { %v433_v0 = vmul.f32 %v2235_v38, %v426_v48  ;;  %v434_v2 = vmul.f32 %v2234_v39, %v423_v47 }
  0xb3   : > { %688 = vmatpush.msra.mxu3 %v1868_v37  ;;  %668 = vmatpush.msra.mxu2 %v1915_v5 }
  0xb5   : > { %689 = vmatpush.msra.mxu3 %v1886_v46  ;;  %669 = vmatpush.msra.mxu2 %v1927_v18 }
  0xb7   : > { %690 = vmatpush.msra.mxu3 %v1900_v54  ;;  %670 = vmatpush.msra.mxu2 %v1944_v26 }
  0xb8   : > { %v439_v49 = vpop.permute.xlu0 %438  ;;  %v583_v47 = vpop.permute.xlu1 %582 }
  0xb9   : > { %v441_v58 = vsel %vm440_vm8, %v439_v49, %v436_v40  ;;  %v444_v63 = vsel %vm440_vm8, %v436_v40, %v439_v49  ;;  %691 = vmatpush.msra.mxu3 %v1920_v15  ;;  %v1963_v40 = vld [vmem:[%s2209_s2 + $0x80] sm:$0xff]  ;;  %671 = vmatpush.msra.mxu2 %v1958_v33 }
  0xba   : > { %v452_v3 = vmul.f32 %v1874_v41, %v444_v63  ;;  %v453_v4 = vmul.f32 %v1876_v42, %v441_v58 }
  0xbb   : > { %692 = vmatpush.msra.mxu3 %v1932_v20 }
  0xbc   : > { %v569_v16 = vpack.c.bf16 %v452_v3, %v433_v0  ;;  %v570_v17 = vpack.c.bf16 %v453_v4, %v434_v2 }
  0xbd   : > { %693 = vmatpush.msra.mxu3 %v1949_v32 }
  0xbe   : > { %603 = vmatpush.bf16.msra.mxu0 %v569_v16  ;;  %616 = vmatpush.bf16.msra.mxu1 %v570_v17 }
  0xbf   : > { %694 = vmatpush.msra.mxu3 %v1963_v40 }
  0xc1   : > { %1350 = vmatmul.msk.bf16.vlgmr.msra.gmra.mxu0 %vm585_vm9, %v568_v21  ;;  %1351 = vmatmul.msk.bf16.vlgmr.msra.gmra.mxu1 %vm585_vm9, %v568_v21 }
 0x13e   : > { %v605_v48 = vpop.f32.mrf.mxu0  ;;  %v618_v49 = vpop.f32.mrf.mxu1 }
 0x13f   : > { %v606_v58 = vadd.f32 %v605_v48, %v583_v47  ;;  %v619_v63 = vadd.f32 %v618_v49, %v583_v47 }
 0x141   : > { %672 = vmatmul.f32.vlgmr.msra.gmra.mxu2 %v606_v58  ;;  %695 = vmatmul.f32.vlgmr.msra.gmra.mxu3 %v619_v63  ;;  %v622_v3 = vmul.f32 %v606_v58, %v606_v58  ;;  %v623_v4 = vmul.f32 %v619_v63, %v619_v63 }
 0x146   : > { %v607_v0 = vpop.f32.mrf.mxu0  ;;  %v620_v2 = vpop.f32.mrf.mxu1 }
 0x149   : > { %675 = vmatmul.f32.gmra.mxu2 %v622_v3  ;;  %698 = vmatmul.f32.gmra.mxu3 %v623_v4 }
 0x1c4   : > { %v673_v16 = vpop.f32.mrf.mxu2  ;;  %v696_v17 = vpop.f32.mrf.mxu3 }
 0x1c5   : > { %v697_v21 = vadd.f32 %v696_v17, %v673_v16 }
 0x1c7   : > { %v702_v39 = vmul.f32 0.00390625, %v697_v21 }
 0x1c9   : > { %v704_v14 = vmul.f32 %v702_v39, %v702_v39 }
 0x1cc   : > { %v676_v38 = vpop.f32.mrf.mxu2  ;;  %v699_v61 = vpop.f32.mrf.mxu3 }
 0x1cd   : > { %v700_v60 = vadd.f32 %v699_v61, %v676_v38 }
 0x1cf   : > { %v703_v13 = vmul.f32 0.00390625, %v700_v60 }
 0x1d1   : > { %v705_v10 = vsub.f32 %v703_v13, %v704_v14 }
 0x1d3   : > { %v706_v48 = vmax.f32 %v705_v10, 0.0 }
 0x1d5   : > { %v707_v47 = vadd.f32 1e-05, %v706_v48 }
 0x1d7   : > { %1424 = vrsqrt.f32 %v707_v47  ;;  %vm714_vm11 = vweird.f32 %v707_v47 }
 0x1dd   : > { %v1425_v49 = vpop.eup %1424 }
 0x1de   : > { %v709_v0 = vmul.f32 %v1425_v49, %v707_v47  ;;  %vm715_vm10 = vweird.f32 %v1425_v49 }
 0x1df   : > { %vm716_vm12 = vmor %vm714_vm11, %vm715_vm10  ;;  %vm742_vm10 = vcmask 261120   ;;  %vm920_vm11 = vcmask 64512  }
 0x1e0   : > { %v710_v2 = vmul.f32 %v1425_v49, %v709_v0 }
 0x1e2   : > { %v711_v9 = vmul.f32 0.5, %v710_v2 }
 0x1e4   : > { %v712_v29 = vsub.f32 1.5, %v711_v9  ;;  %v868_v9 = vld [vmem:[%s2214_s7] sm:$0xff] }
 0x1e6   : > { %v713_v3 = vmul.f32 %v1425_v49, %v712_v29  ;;  %v914_v29 = vld [vmem:[%s2216_s9] sm:$0xff] }
 0x1e8   : > { %v717_v4 = vsel %vm716_vm12, %v1425_v49, %v713_v3 }
 0x1e9   : > { %721 = vperm.xlu2 %1422, %v717_v4   ;;  %v718_v16 = vmul.f32 %v717_v4, %v702_v39 }
 0x1eb   : > { %728 = vperm.xlu0 %1423, %v718_v16  }
 0x243   : > { %v722_v61 = vpop.permute.xlu2 %721 }
 0x244   : > { %v724_v38 = vmul.f32 %v722_v61, %v606_v58  ;;  %v725_v60 = vmul.f32 %v722_v61, %v619_v63  ;;  %v1355_v58 = vld [vmem:[%s2261_s1 + $0x13] ss:$8 sm:$0x3] }
 0x245   : > { %v851_v63 = vperm.slane %v1355_v58, 0  ;;  %v852_v48 = vperm.slane %v1355_v58, 1 }
 0x25d   : > { %v729_v13 = vpop.permute.xlu0 %728 }
 0x25e   : > { %v731_v10 = vsub.f32 %v724_v38, %v729_v13  ;;  %v732_v14 = vsub.f32 %v725_v60, %v729_v13 }
 0x260   : > { %v1967_v17 = vmax.f32 %v731_v10, 0.0  ;;  %v1969_v21 = vmax.f32 %v732_v14, 0.0 }
 0x262   : > { %840 = vrot.lane.b32.xlu2 %v1969_v21, %s1505_s18  ;;  %827 = vrot.lane.b32.xlu0 %v1967_v17, %s2244_s27 }
 0x263   : > { %838 = vrot.lane.b32.xlu1 %v1967_v17, %s1505_s18  ;;  %s2272_s18 = smov 16  }
 0x26a   : > { %780 = vrot.lane.b32.xlu0 %v1969_v21, %s1506_s19  ;;  %819 = vrot.lane.b32.xlu2 %v1967_v17, %s2270_s14 }
 0x26b   : > { %816 = vrot.lane.b32.xlu1 %v1969_v21, %s2270_s14 }
 0x272   : > { %767 = vrot.lane.b32.xlu0 %v1967_v17, %s2271_s3  ;;  %778 = vrot.lane.b32.xlu2 %v1967_v17, %s1506_s19 }
 0x273   : > { %829 = vrot.lane.b32.xlu1 %v1969_v21, %s2244_s27  ;;  %s2275_s27 = smov 127  }
 0x27a   : > { %740 = vrot.lane.b32.xlu0 %v1967_v17, %s1507_s25  ;;  %800 = vrot.lane.b32.xlu2 %v1967_v17, %s1508_s28 }
 0x27b   : > { %797 = vrot.lane.b32.xlu1 %v1969_v21, %s1508_s28  ;;  %s2273_s28 = smov 111  }
 0x282   : > { %871 = vperm.xlu0 %1423, %v868_v9   ;;  %736 = vrot.lane.b32.xlu2 %v1969_v21, %s1507_s25  ;;  %s2276_s25 = smov 15  }
 0x283   : > { %769 = vrot.lane.b32.xlu1 %v1969_v21, %s2271_s3 }
 0x28a   : > { %759 = vrot.lane.b32.xlu2 %v1967_v17, %s2272_s18 }
 0x28b   : > { %756 = vrot.lane.b32.xlu1 %v1969_v21, %s2272_s18 }
 0x293   : > { %917 = vperm.xlu1 %1421, %v914_v29  }
 0x2bc   : > { %v841_v39 = vpop.permute.xlu2 %840 }
 0x2c4   : > { %v820_v47 = vpop.permute.xlu2 %819 }
 0x2cc   : > { %v779_v14 = vpop.permute.xlu2 %778 }
 0x2d4   : > { %v828_v38 = vpop.permute.xlu0 %827 }
 0x2d5   : > { %v839_v49 = vpop.permute.xlu1 %838 }
 0x2d6   : > { %v843_v0 = vsel %vm842_vm13, %v839_v49, %v841_v39  ;;  %v847_v2 = vsel %vm842_vm13, %v841_v39, %v839_v49 }
 0x2d7   : > { %v855_v3 = vmul.f32 %v851_v63, %v843_v0  ;;  %v856_v4 = vmul.f32 %v852_v48, %v847_v2  ;;  %v1353_v48 = vld [vmem:[%s2261_s1 + $0x11] ss:$8 sm:$0x3] }
 0x2d9   : > { %v866_v16 = vpack.c.bf16 %v855_v3, %v855_v3  ;;  %v867_v61 = vpack.c.bf16 %v856_v4, %v856_v4  ;;  %v801_v4 = vpop.permute.xlu2 %800 }
 0x2db   : > { %v878_v60 = vsel %vm589_vm3, %v866_v16, 0  ;;  %v881_v13 = vsel %vm589_vm3, %v867_v61, 0  ;;  %v791_v61 = vperm.slane %v1353_v48, 0 }
 0x2dc   : > { %886 = vmatpush.bf16.msrb.mxu0 %v878_v60  ;;  %899 = vmatpush.bf16.msrb.mxu1 %v881_v13  ;;  %v781_v58 = vpop.permute.xlu0 %780 }
 0x2dd   : > { %v817_v10 = vpop.permute.xlu1 %816 }
 0x2de   : > { %v821_v9 = vsel %vm478_vm5, %v820_v47, %v817_v10  ;;  %v824_v29 = vsel %vm478_vm5, %v817_v10, %v820_v47  ;;  %v1354_v47 = vld [vmem:[%s2261_s1 + $0x12] ss:$8 sm:$0x3]  ;;  %v783_v10 = vsel %vm782_vm14, %v779_v14, %v781_v58 }
 0x2df   : > { %v825_v49 = vmul.f32 %v824_v29, %v1752_v55  ;;  %v826_v0 = vmul.f32 %v821_v9, %v1765_v59  ;;  %v810_v60 = vperm.slane %v1354_v47, 0  ;;  %v811_v13 = vperm.slane %v1354_v47, 1  ;;  %v1352_v47 = vld [vmem:[%s2261_s1 + $0x10] ss:$8 sm:$0x3] }
 0x2e0   : > { %v787_v9 = vsel %vm782_vm14, %v781_v58, %v779_v14  ;;  %v795_v59 = vmul.f32 %v791_v61, %v783_v10 }
 0x2e5   : > { %v830_v51 = vpop.permute.xlu1 %829 }
 0x2e6   : > { %v831_v39 = vsel %vm496_vm4, %v828_v38, %v830_v51  ;;  %v835_v63 = vsel %vm496_vm4, %v830_v51, %v828_v38  ;;  %v792_v38 = vperm.slane %v1353_v48, 1 }
 0x2e7   : > { %v836_v2 = vmul.f32 %v831_v39, %v1709_v35  ;;  %v837_v3 = vmul.f32 %v835_v63, %v1711_v36  ;;  %v768_v36 = vpop.permute.xlu0 %767 }
 0x2e8   : > { %v796_v55 = vmul.f32 %v792_v38, %v787_v9 }
 0x2e9   : > { %v864_v16 = vpack.c.bf16 %v836_v2, %v825_v49  ;;  %v865_v51 = vpack.c.bf16 %v837_v3, %v826_v0  ;;  %v737_v0 = vpop.permute.xlu2 %736 }
 0x2eb   : > { %887 = vmatpush.bf16.msrb.mxu0 %v864_v16  ;;  %900 = vmatpush.bf16.msrb.mxu1 %v865_v51 }
 0x2ed   : > { %v798_v29 = vpop.permute.xlu1 %797 }
 0x2ee   : > { %v803_v39 = vsel %vm802_vm15, %v801_v4, %v798_v29  ;;  %v806_v63 = vsel %vm802_vm15, %v798_v29, %v801_v4  ;;  %v857_v29 = vld [vmem:[%s2213_s6] sm:$0xf] }
 0x2ef   : > { %v814_v35 = vmul.f32 %v810_v60, %v806_v63  ;;  %v815_v8 = vmul.f32 %v811_v13, %v803_v39  ;;  %v741_v4 = vpop.permute.xlu0 %740 }
 0x2f1   : > { %v862_v6 = vpack.c.bf16 %v814_v35, %v795_v59  ;;  %v863_v49 = vpack.c.bf16 %v815_v8, %v796_v55  ;;  %v750_v35 = vperm.slane %v1352_v47, 0  ;;  %v751_v55 = vperm.slane %v1352_v47, 1  ;;  %v760_v16 = vpop.permute.xlu2 %759 }
 0x2f2   : > { %v743_v59 = vsel %vm742_vm10, %v741_v4, %v737_v0 }
 0x2f3   : > { %888 = vmatpush.bf16.msrb.mxu0 %v862_v6  ;;  %901 = vmatpush.bf16.msrb.mxu1 %v863_v49  ;;  %v755_v13 = vmul.f32 %v751_v55, %v743_v59 }
 0x2f5   : > { %v770_v48 = vpop.permute.xlu1 %769 }
 0x2f6   : > { %v771_v2 = vsel %vm534_vm0, %v768_v36, %v770_v48  ;;  %v775_v3 = vsel %vm534_vm0, %v770_v48, %v768_v36  ;;  %v746_v36 = vsel %vm742_vm10, %v737_v0, %v741_v4 }
 0x2f7   : > { %v776_v14 = vmul.f32 %v771_v2, %v1682_v11  ;;  %v777_v58 = vmul.f32 %v775_v3, %v1684_v12  ;;  %v754_v60 = vmul.f32 %v750_v35, %v746_v36  ;;  %v872_v39 = vpop.permute.xlu0 %871  ;;  %v911_v35 = vld [vmem:[%s2215_s8] sm:$0xf] }
 0x2f9   : > { %v860_v8 = vpack.c.bf16 %v776_v14, %v1967_v17  ;;  %v861_v6 = vpack.c.bf16 %v777_v58, %v1969_v21 }
 0x2fb   : > { %889 = vmatpush.bf16.msrb.mxu0 %v860_v8  ;;  %902 = vmatpush.bf16.msrb.mxu1 %v861_v6 }
 0x2fd   : > { %v757_v51 = vpop.permute.xlu1 %756 }
 0x2fe   : > { %v761_v61 = vsel %vm440_vm8, %v760_v16, %v757_v51  ;;  %v764_v38 = vsel %vm440_vm8, %v757_v51, %v760_v16 }
 0x2ff   : > { %v765_v10 = vmul.f32 %v764_v38, %v1874_v41  ;;  %v766_v17 = vmul.f32 %v761_v61, %v1876_v42 }
 0x301   : > { %v858_v9 = vpack.c.bf16 %v765_v10, %v754_v60  ;;  %v859_v21 = vpack.c.bf16 %v766_v17, %v755_v13 }
 0x303   : > { %890 = vmatpush.bf16.msrb.mxu0 %v858_v9  ;;  %903 = vmatpush.bf16.msrb.mxu1 %v859_v21 }
 0x305   : > { %v918_v55 = vpop.permute.xlu1 %917 }
 0x306   : > { %1356 = vmatmul.msk.bf16.vlgmr.msrb.gmra.mxu0 %vm585_vm9, %v857_v29  ;;  %1357 = vmatmul.msk.bf16.vlgmr.msrb.gmra.mxu1 %vm585_vm9, %v857_v29 }
 0x383   : > { %v892_v63 = vpop.f32.mrf.mxu0  ;;  %v905_v49 = vpop.f32.mrf.mxu1 }
 0x384   : > { %v893_v0 = vadd.f32 %v892_v63, %v872_v39  ;;  %v906_v48 = vadd.f32 %v905_v49, %v872_v39 }
 0x386   : > { %v909_v2 = vmax.f32 %v893_v0, 0.0  ;;  %v910_v3 = vmax.f32 %v906_v48, 0.0 }
 0x388   : > { %v912_v14 = vpack.c.bf16 %v909_v2, %v909_v2  ;;  %v913_v58 = vpack.c.bf16 %v910_v3, %v910_v3 }
 0x38a   : > { %v925_v47 = vsel %vm589_vm3, %v912_v14, 0  ;;  %v928_v4 = vsel %vm589_vm3, %v913_v58, 0 }
 0x38b   : > { %v894_v8 = vpop.f32.mrf.mxu0  ;;  %v907_v6 = vpop.f32.mrf.mxu1  ;;  %937 = vmatpush.bf16.msra.mxu0 %v925_v47  ;;  %950 = vmatpush.bf16.msra.mxu1 %v928_v4 }
 0x38e   : > { %1358 = vmatmul.msk.bf16.vlgmr.msra.gmra.mxu0 %vm920_vm11, %v911_v35  ;;  %1359 = vmatmul.msk.bf16.vlgmr.msra.gmra.mxu1 %vm920_vm11, %v911_v35 }
 0x38f   : > { %958 = vmatpush.msrb.mxu0 %v1721_v44  ;;  %981 = vmatpush.msrb.mxu1 %v1726_v45 }
 0x391   : > { %959 = vmatpush.msrb.mxu0 %v1737_v50  ;;  %982 = vmatpush.msrb.mxu1 %v1747_v52 }
 0x393   : > { %960 = vmatpush.msrb.mxu0 %v1758_v56  ;;  %983 = vmatpush.msrb.mxu1 %v1763_v57 }
 0x395   : > { %961 = vmatpush.msrb.mxu0 %v1773_v62  ;;  %984 = vmatpush.msrb.mxu1 %v1780_v1 }
 0x397   : > { %962 = vmatpush.msrb.mxu0 %v1789_v7  ;;  %985 = vmatpush.msrb.mxu1 %v1801_v19 }
 0x399   : > { %963 = vmatpush.msrb.mxu0 %v1808_v22  ;;  %986 = vmatpush.msrb.mxu1 %v1813_v23 }
 0x39b   : > { %964 = vmatpush.msrb.mxu0 %v1819_v24  ;;  %987 = vmatpush.msrb.mxu1 %v1824_v25 }
 0x39d   : > { %965 = vmatpush.msrb.mxu0 %v1831_v27  ;;  %988 = vmatpush.msrb.mxu1 %v1836_v28 }
 0x39f   : > { %966 = vmatpush.msrb.mxu0 %v1848_v30  ;;  %989 = vmatpush.msrb.mxu1 %v1853_v31 }
 0x3a1   : > { %967 = vmatpush.msrb.mxu0 %v1863_v34  ;;  %990 = vmatpush.msrb.mxu1 %v1868_v37 }
 0x3a3   : > { %968 = vmatpush.msrb.mxu0 %v1881_v43  ;;  %991 = vmatpush.msrb.mxu1 %v1886_v46 }
 0x3a5   : > { %969 = vmatpush.msrb.mxu0 %v1895_v53  ;;  %992 = vmatpush.msrb.mxu1 %v1900_v54 }
 0x3a7   : > { %970 = vmatpush.msrb.mxu0 %v1915_v5  ;;  %993 = vmatpush.msrb.mxu1 %v1920_v15 }
 0x3a9   : > { %971 = vmatpush.msrb.mxu0 %v1927_v18  ;;  %994 = vmatpush.msrb.mxu1 %v1932_v20 }
 0x3ab   : > { %972 = vmatpush.msrb.mxu0 %v1944_v26  ;;  %995 = vmatpush.msrb.mxu1 %v1949_v32 }
 0x3ad   : > { %973 = vmatpush.msrb.mxu0 %v1958_v33  ;;  %996 = vmatpush.msrb.mxu1 %v1963_v40 }
 0x40b   : > { %v939_v59 = vpop.f32.mrf.mxu0  ;;  %v952_v36 = vpop.f32.mrf.mxu1 }
 0x40c   : > { %v940_v16 = vadd.f32 %v939_v59, %v918_v55  ;;  %v953_v51 = vadd.f32 %v952_v36, %v918_v55 }
 0x40e   : > { %974 = vmatmul.f32.vlgmr.msrb.gmra.mxu0 %v940_v16  ;;  %997 = vmatmul.f32.vlgmr.msrb.gmra.mxu1 %v953_v51  ;;  %v956_v60 = vmul.f32 %v940_v16, %v940_v16  ;;  %v957_v13 = vmul.f32 %v953_v51, %v953_v51 }
 0x413   : > { %v941_v61 = vpop.f32.mrf.mxu0  ;;  %v954_v38 = vpop.f32.mrf.mxu1 }
 0x416   : > { %977 = vmatmul.f32.gmra.mxu0 %v956_v60  ;;  %1000 = vmatmul.f32.gmra.mxu1 %v957_v13 }
 0x48b   : > { %v975_v10 = vpop.f32.mrf.mxu0  ;;  %v998_v17 = vpop.f32.mrf.mxu1 }
 0x48c   : > { %v999_v9 = vadd.f32 %v998_v17, %v975_v10 }
 0x48e   : > { %v1004_v21 = vmul.f32 0.00390625, %v999_v9 }
 0x490   : > { %v1006_v49 = vmul.f32 %v1004_v21, %v1004_v21 }
 0x493   : > { %v978_v29 = vpop.f32.mrf.mxu0  ;;  %v1001_v39 = vpop.f32.mrf.mxu1 }
 0x494   : > { %v1002_v63 = vadd.f32 %v1001_v39, %v978_v29  ;;  %v2278_v29 = vld [vmem:[#allocation5_spill] sm:$0xff] }
 0x495   : > { %v2279_v39 = vperm.slane %v2278_v29, 0 }
 0x496   : > { %v1005_v0 = vmul.f32 0.00390625, %v1002_v63 }
 0x498   : > { %v1007_v48 = vsub.f32 %v1005_v0, %v1006_v49  ;;  %v2280_v49 = vperm.slane %v2278_v29, 1 }
 0x49a   : > { %v1008_v2 = vmax.f32 %v1007_v48, 0.0 }
 0x49c   : > { %v1009_v3 = vadd.f32 1e-05, %v1008_v2 }
 0x49e   : > { %1426 = vrsqrt.f32 %v1009_v3  ;;  %vm1016_vm13 = vweird.f32 %v1009_v3 }
 0x4a4   : > { %v1427_v14 = vpop.eup %1426 }
 0x4a5   : > { %v1011_v58 = vmul.f32 %v1427_v14, %v1009_v3  ;;  %vm1017_vm12 = vweird.f32 %v1427_v14 }
 0x4a6   : > { %vm1018_vm14 = vmor %vm1016_vm13, %vm1017_vm12 }
 0x4a7   : > { %v1012_v47 = vmul.f32 %v1427_v14, %v1011_v58 }
 0x4a9   : > { %v1013_v4 = vmul.f32 0.5, %v1012_v47 }
 0x4ab   : > { %v1014_v8 = vsub.f32 1.5, %v1013_v4 }
 0x4ad   : > { %v1015_v6 = vmul.f32 %v1427_v14, %v1014_v8 }
 0x4af   : > { %v1019_v35 = vsel %vm1018_vm14, %v1427_v14, %v1015_v6 }
 0x4b0   : > { %1023 = vperm.xlu2 %1422, %v1019_v35   ;;  %v1020_v55 = vmul.f32 %v1019_v35, %v1004_v21 }
 0x4b2   : > { %1030 = vperm.xlu0 %1423, %v1020_v55  }
 0x50a   : > { %v1024_v59 = vpop.permute.xlu2 %1023 }
 0x50b   : > { %v1026_v36 = vmul.f32 %v1024_v59, %v940_v16  ;;  %v1027_v61 = vmul.f32 %v1024_v59, %v953_v51  ;;  %v1136_v16 = vld [vmem:[%s2218_s11] sm:$0xff] }
 0x524   : > { %v1031_v38 = vpop.permute.xlu0 %1030 }
 0x525   : > { %v1033_v60 = vsub.f32 %v1026_v36, %v1031_v38  ;;  %v1034_v13 = vsub.f32 %v1027_v61, %v1031_v38  ;;  %v2281_v61 = vld [vmem:[#allocation6_spill] sm:$0xff] }
 0x526   : > { %v2282_v38 = vperm.slane %v2281_v61, 0 }
 0x527   : > { %1116 = vrot.lane.b32.xlu2 %v1034_v13, %s2273_s28  ;;  %1092 = vrot.lane.b32.xlu0 %v1033_v60, %s2274_s15 }
 0x528   : > { %1114 = vrot.lane.b32.xlu1 %v1033_v60, %s2273_s28  ;;  %s404_s28 = sand.u32 1, %s1486_s21  }
 0x52f   : > { %1103 = vrot.lane.b32.xlu2 %v1033_v60, %s2271_s3  ;;  %1105 = vrot.lane.b32.xlu0 %v1034_v13, %s2271_s3 }
 0x530   : > { %1094 = vrot.lane.b32.xlu1 %v1034_v13, %s2274_s15  ;;  %s1340_s15 = sshll.u32 %s404_s28, 4 }
 0x531   : > { %s406_s19 = scalar_lea.vmem [#allocation2], %s1340_s15 }
 0x537   : > { %1083 = vrot.lane.b32.xlu2 %v1034_v13, %s2275_s27  ;;  %1059 = vrot.lane.b32.xlu0 %v1034_v13, %s2276_s25 }
 0x538   : > { %1081 = vrot.lane.b32.xlu1 %v1033_v60, %s2275_s27  ;;  %s1368_s27 = sshll.u32 %s1595_s24, 4  ;;  %s1261_s24 = scalar_lea.sflag [#allocation3], %s404_s28 }
 0x539   : > { %s1272_s3 = scalar_lea.hbm %s2219_s12, %s1368_s27 }
 0x53f   : > { %1070 = vrot.lane.b32.xlu2 %v1034_v13, %s2270_s14  ;;  %1073 = vrot.lane.b32.xlu0 %v1033_v60, %s2270_s14  ;;  %s1274_s14 = sshll.u32 %s406_s19, 4  ;;  %s1275_s14 = int_to_ptr.vmem [resolvable:$true] %s1274_s14 }
 0x540   : > { %1062 = vrot.lane.b32.xlu1 %v1033_v60, %s2276_s25 }
 0x547   : > { %1040 = vrot.lane.b32.xlu2 %v1033_v60, %s2277_s16  ;;  %1048 = vrot.lane.b32.xlu0 %v1034_v13, %s2272_s18 }
 0x548   : > { %1036 = vrot.lane.b32.xlu1 %v1034_v13, %s2277_s16 }
 0x54f   : > { %1139 = vperm.xlu2 %1422, %v1136_v16  }
 0x550   : > { %1051 = vrot.lane.b32.xlu1 %v1033_v60, %s2272_s18  ;;  %s1276_s18 = sshll.u32 %s1272_s3, 4  ;;  %s1452_s3 = scalar_lea.hbm %s2219_s12, 32  ;;  %s1277_s18 = int_to_ptr.hbm [resolvable:$true] %s1276_s18 }
 0x551   : > { %s1446_s25 = sshra.s32 %s1277_s18, 4  ;;  %s1447_s25 = int_to_ptr.hbm [resolvable:$true] %s1446_s25 }
 0x552   : > { %s1448_s27 = scalar_lea.hbm %s1447_s25, 16  ;;  %p1453_p0 = scmp.lt.s32.totalorder %s1447_s25, %s2219_s12 }
 0x553   : > { %p1449_p11 = scmp.ne.s32.totalorder %s1447_s25, %s1448_s27  ;;  %p1454_p1 = scmp.lt.s32.totalorder %s1452_s3, %s1448_s27 }
 0x555   : > { %p1450_p12 = pnand %p1449_p11, %p1612_p5  ;;  %p1455_p2 = por %p1454_p1, %p1453_p0 }
 0x557   : > { %p1451_p13 = pneg %p1450_p12 }
 0x559   : > { %p1456_p3 = pnand %p1455_p2, %p1451_p13 }
 0x581   : > { %v1117_v51 = vpop.permute.xlu2 %1116 }
 0x589   : > { %v1104_v48 = vpop.permute.xlu2 %1103 }
 0x591   : > { %v1084_v29 = vpop.permute.xlu2 %1083 }
 0x599   : > { %v1093_v10 = vpop.permute.xlu0 %1092 }
 0x59a   : > { %v1115_v17 = vpop.permute.xlu1 %1114 }
 0x59b   : > { %v1118_v9 = vsel %vm553_vm2, %v1115_v17, %v1117_v51  ;;  %v1122_v21 = vsel %vm553_vm2, %v1117_v51, %v1115_v17  ;;  %v2283_v51 = vperm.slane %v2281_v61, 1 }
 0x59c   : > { %v1123_v63 = vmul.f32 %v1118_v9, %v2279_v39  ;;  %v1124_v0 = vmul.f32 %v1122_v21, %v2280_v49  ;;  %v2284_v49 = vld [vmem:[#allocation7_spill] sm:$0xff] }
 0x59e   : > { %v1134_v2 = vpack.c.bf16 %v1123_v63, %v1123_v63  ;;  %v1135_v3 = vpack.c.bf16 %v1124_v0, %v1124_v0 }
 0x5a0   : > { %v1146_v14 = vsel %vm589_vm3, %v1134_v2, 0  ;;  %v1149_v58 = vsel %vm589_vm3, %v1135_v3, 0 }
 0x5a1   : > { %1154 = vmatpush.bf16.msrb.mxu2 %v1146_v14  ;;  %1167 = vmatpush.bf16.msrb.mxu3 %v1149_v58  ;;  %v1106_v47 = vpop.permute.xlu0 %1105  ;;  %v1071_v14 = vpop.permute.xlu2 %1070 }
 0x5a2   : > { %v1107_v4 = vsel %vm534_vm0, %v1104_v48, %v1106_v47  ;;  %v1111_v8 = vsel %vm534_vm0, %v1106_v47, %v1104_v48  ;;  %v1095_v6 = vpop.permute.xlu1 %1094 }
 0x5a3   : > { %v1112_v35 = vmul.f32 %v1107_v4, %v1682_v11  ;;  %v1113_v55 = vmul.f32 %v1111_v8, %v1684_v12  ;;  %v1096_v59 = vsel %vm515_vm1, %v1093_v10, %v1095_v6  ;;  %v1100_v36 = vsel %vm515_vm1, %v1095_v6, %v1093_v10  ;;  %v2285_v10 = vld [vmem:[#allocation8_spill] sm:$0xff]  ;;  %v2286_v6 = vld [vmem:[#allocation10_spill] sm:$0xff] }
 0x5a4   : > { %v1101_v16 = vmul.f32 %v1096_v59, %v2282_v38  ;;  %v1102_v17 = vmul.f32 %v1100_v36, %v2283_v51  ;;  %v2288_v38 = vld [vmem:[#allocation9_spill] sm:$0xff] }
 0x5a6   : > { %v1132_v9 = vpack.c.bf16 %v1112_v35, %v1101_v16  ;;  %v1133_v21 = vpack.c.bf16 %v1113_v55, %v1102_v17  ;;  %v2287_v55 = vld [vmem:[#allocation11_spill] sm:$0xff]  ;;  %v2290_v16 = vperm.slane %v2288_v38, 1 }
 0x5a8   : > { %1155 = vmatpush.bf16.msrb.mxu2 %v1132_v9  ;;  %1168 = vmatpush.bf16.msrb.mxu3 %v1133_v21 }
 0x5a9   : > { %v1060_v39 = vpop.permute.xlu0 %1059 }
 0x5aa   : > { %v1082_v63 = vpop.permute.xlu1 %1081 }
 0x5ab   : > { %v1085_v11 = vsel %vm496_vm4, %v1082_v63, %v1084_v29  ;;  %v1089_v12 = vsel %vm496_vm4, %v1084_v29, %v1082_v63  ;;  %v1041_v29 = vpop.permute.xlu2 %1040 }
 0x5ac   : > { %v1090_v0 = vmul.f32 %v1085_v11, %v2284_v49  ;;  %v1091_v48 = vmul.f32 %v1089_v12, %v2285_v10  ;;  %v2291_v10 = vld [vmem:[#allocation12_spill] sm:$0xff] }
 0x5ae   : > { %v1130_v2 = vpack.c.bf16 %v1090_v0, %v1033_v60  ;;  %v1131_v3 = vpack.c.bf16 %v1091_v48, %v1034_v13  ;;  %v2289_v60 = vperm.slane %v2288_v38, 0  ;;  %v2292_v48 = vperm.slane %v2291_v10, 0 }
 0x5b0   : > { %1156 = vmatpush.bf16.msrb.mxu2 %v1130_v2  ;;  %1169 = vmatpush.bf16.msrb.mxu3 %v1131_v3  ;;  %v2293_v3 = vperm.slane %v2291_v10, 1 }
 0x5b1   : > { %v1074_v58 = vpop.permute.xlu0 %1073 }
 0x5b2   : > { %v1075_v47 = vsel %vm478_vm5, %v1074_v58, %v1071_v14  ;;  %v1078_v4 = vsel %vm478_vm5, %v1071_v14, %v1074_v58  ;;  %v1063_v8 = vpop.permute.xlu1 %1062 }
 0x5b3   : > { %v1079_v35 = vmul.f32 %v1078_v4, %v2286_v6  ;;  %v1080_v59 = vmul.f32 %v1075_v47, %v2287_v55  ;;  %v1064_v36 = vsel %vm459_vm6, %v1063_v8, %v1060_v39  ;;  %v1067_v61 = vsel %vm459_vm6, %v1060_v39, %v1063_v8  ;;  %v1125_v6 = vld [vmem:[%s2217_s10] sm:$0xf] }
 0x5b4   : > { %v1068_v13 = vmul.f32 %v1067_v61, %v2289_v60  ;;  %v1069_v51 = vmul.f32 %v1064_v36, %v2290_v16  ;;  %v1430_v55 = vld [vmem:[%s1627_s17] sm:$0xff]  ;;  %v1431_v36 = vld [vmem:[%s1627_s17 + $0x8] sm:$0xff] }
 0x5b6   : > { %v1128_v17 = vpack.c.bf16 %v1079_v35, %v1068_v13  ;;  %v1129_v9 = vpack.c.bf16 %v1080_v59, %v1069_v51 }
 0x5b8   : > { %1157 = vmatpush.bf16.msrb.mxu2 %v1128_v17  ;;  %1170 = vmatpush.bf16.msrb.mxu3 %v1129_v9 }
 0x5b9   : > { %v1049_v12 = vpop.permute.xlu0 %1048 }
 0x5ba   : > { %v1037_v21 = vpop.permute.xlu1 %1036 }
 0x5bb   : > { %v1042_v63 = vsel %vm422_vm7, %v1041_v29, %v1037_v21  ;;  %v1045_v11 = vsel %vm422_vm7, %v1037_v21, %v1041_v29 }
 0x5bc   : > { %v1046_v2 = vmul.f32 %v1045_v11, %v2292_v48  ;;  %v1047_v14 = vmul.f32 %v1042_v63, %v2293_v3 }
 0x5c2   : > { %v1052_v49 = vpop.permute.xlu1 %1051 }
 0x5c3   : > { %v1053_v39 = vsel %vm440_vm8, %v1052_v49, %v1049_v12  ;;  %v1056_v0 = vsel %vm440_vm8, %v1049_v12, %v1052_v49 }
 0x5c4   : > { %v1057_v58 = vmul.f32 %v1056_v0, %v1874_v41  ;;  %v1058_v47 = vmul.f32 %v1053_v39, %v1876_v42 }
 0x5c6   : > { %v1126_v4 = vpack.c.bf16 %v1057_v58, %v1046_v2  ;;  %v1127_v8 = vpack.c.bf16 %v1058_v47, %v1047_v14 }
 0x5c8   : > { %1158 = vmatpush.bf16.msrb.mxu2 %v1126_v4  ;;  %1171 = vmatpush.bf16.msrb.mxu3 %v1127_v8 }
 0x5cb   : > { %1360 = vmatmul.msk.bf16.vlgmr.msrb.gmra.mxu2 %vm585_vm9, %v1125_v6  ;;  %1361 = vmatmul.msk.bf16.vlgmr.msrb.gmra.mxu3 %vm585_vm9, %v1125_v6 }
 0x5cc   : > { %1179 = vmatpush.msra.mxu2 %v1721_v44  ;;  %1202 = vmatpush.msra.mxu3 %v1726_v45  ;;  %v1140_v44 = vpop.permute.xlu2 %1139 }
 0x5ce   : > { %1180 = vmatpush.msra.mxu2 %v1737_v50  ;;  %1203 = vmatpush.msra.mxu3 %v1747_v52 }
 0x5d0   : > { %1181 = vmatpush.msra.mxu2 %v1758_v56  ;;  %1204 = vmatpush.msra.mxu3 %v1763_v57 }
 0x5d2   : > { %1182 = vmatpush.msra.mxu2 %v1773_v62  ;;  %1205 = vmatpush.msra.mxu3 %v1780_v1 }
 0x5d4   : > { %1183 = vmatpush.msra.mxu2 %v1789_v7  ;;  %1206 = vmatpush.msra.mxu3 %v1801_v19 }
 0x5d6   : > { %1184 = vmatpush.msra.mxu2 %v1808_v22  ;;  %1207 = vmatpush.msra.mxu3 %v1813_v23 }
 0x5d8   : > { %1185 = vmatpush.msra.mxu2 %v1819_v24  ;;  %1208 = vmatpush.msra.mxu3 %v1824_v25 }
 0x5da   : > { %1186 = vmatpush.msra.mxu2 %v1831_v27  ;;  %1209 = vmatpush.msra.mxu3 %v1836_v28 }
 0x5dc   : > { %1187 = vmatpush.msra.mxu2 %v1848_v30  ;;  %1210 = vmatpush.msra.mxu3 %v1853_v31 }
 0x5de   : > { %1188 = vmatpush.msra.mxu2 %v1863_v34  ;;  %1211 = vmatpush.msra.mxu3 %v1868_v37 }
 0x5e0   : > { %1189 = vmatpush.msra.mxu2 %v1881_v43  ;;  %1212 = vmatpush.msra.mxu3 %v1886_v46 }
 0x5e2   : > { %1190 = vmatpush.msra.mxu2 %v1895_v53  ;;  %1213 = vmatpush.msra.mxu3 %v1900_v54 }
 0x5e4   : > { %1191 = vmatpush.msra.mxu2 %v1915_v5  ;;  %1214 = vmatpush.msra.mxu3 %v1920_v15 }
 0x5e6   : > { %1192 = vmatpush.msra.mxu2 %v1927_v18  ;;  %1215 = vmatpush.msra.mxu3 %v1932_v20 }
 0x5e8   : > { %1193 = vmatpush.msra.mxu2 %v1944_v26  ;;  %1216 = vmatpush.msra.mxu3 %v1949_v32 }
 0x5ea   : > { %1194 = vmatpush.msra.mxu2 %v1958_v33  ;;  %1217 = vmatpush.msra.mxu3 %v1963_v40 }
 0x64e   : > { %v1160_v45 = vpop.f32.mrf.mxu2  ;;  %v1173_v50 = vpop.f32.mrf.mxu3 }
 0x64f   : > { %v1161_v52 = vadd.f32 %v1160_v45, %v1140_v44  ;;  %v1174_v56 = vadd.f32 %v1173_v50, %v1140_v44 }
 0x651   : > { %1195 = vmatmul.f32.vlgmr.msra.gmra.mxu2 %v1161_v52  ;;  %1218 = vmatmul.f32.vlgmr.msra.gmra.mxu3 %v1174_v56  ;;  %v1177_v1 = vmul.f32 %v1161_v52, %v1161_v52  ;;  %v1178_v7 = vmul.f32 %v1174_v56, %v1174_v56 }
 0x656   : > { %v1162_v57 = vpop.f32.mrf.mxu2  ;;  %v1175_v62 = vpop.f32.mrf.mxu3 }
 0x659   : > { %1198 = vmatmul.f32.gmra.mxu2 %v1177_v1  ;;  %1221 = vmatmul.f32.gmra.mxu3 %v1178_v7 }
 0x6d4   : > { %v1196_v19 = vpop.f32.mrf.mxu2  ;;  %v1219_v22 = vpop.f32.mrf.mxu3 }
 0x6d5   : > { %v1220_v23 = vadd.f32 %v1219_v22, %v1196_v19 }
 0x6d7   : > { %v1225_v24 = vmul.f32 0.00390625, %v1220_v23 }
 0x6d9   : > { %v1227_v30 = vmul.f32 %v1225_v24, %v1225_v24 }
 0x6dc   : > { %v1199_v25 = vpop.f32.mrf.mxu2  ;;  %v1222_v27 = vpop.f32.mrf.mxu3 }
 0x6dd   : > { %v1223_v28 = vadd.f32 %v1222_v27, %v1199_v25 }
 0x6df   : > { %v1226_v31 = vmul.f32 0.00390625, %v1223_v28 }
 0x6e1   : > { %v1228_v34 = vsub.f32 %v1226_v31, %v1227_v30 }
 0x6e3   : > { %v1229_v37 = vmax.f32 %v1228_v34, 0.0 }
 0x6e5   : > { %v1230_v41 = vadd.f32 1e-05, %v1229_v37 }
 0x6e7   : > { %1428 = vrsqrt.f32 %v1230_v41  ;;  %vm1237_vm1 = vweird.f32 %v1230_v41 }
 0x6ed   : > { %v1429_v42 = vpop.eup %1428 }
 0x6ee   : > { %v1232_v43 = vmul.f32 %v1429_v42, %v1230_v41  ;;  %vm1238_vm0 = vweird.f32 %v1429_v42 }
 0x6ef   : > { %vm1239_vm2 = vmor %vm1237_vm1, %vm1238_vm0 }
 0x6f0   : > { %v1233_v46 = vmul.f32 %v1429_v42, %v1232_v43 }
 0x6f2   : > { %v1234_v53 = vmul.f32 0.5, %v1233_v46 }
 0x6f4   : > { %v1235_v54 = vsub.f32 1.5, %v1234_v53 }
 0x6f6   : > { %v1236_v5 = vmul.f32 %v1429_v42, %v1235_v54 }
 0x6f8   : > { %v1240_v15 = vsel %vm1239_vm2, %v1429_v42, %v1236_v5 }
 0x6f9   : > { %1244 = vperm.xlu0 %1423, %v1240_v15   ;;  %v1241_v18 = vmul.f32 %v1240_v15, %v1225_v24 }
 0x6fb   : > { %1251 = vperm.xlu1 %1421, %v1241_v18  }
 0x76b   : > { %v1245_v20 = vpop.permute.xlu0 %1244 }
 0x76c   : > { %v1247_v26 = vmul.f32 %v1245_v20, %v1161_v52  ;;  %v1248_v32 = vmul.f32 %v1245_v20, %v1174_v56 }
 0x76d   : > { %v1252_v33 = vpop.permute.xlu1 %1251 }
 0x76e   : > { %v1254_v40 = vsub.f32 %v1247_v26, %v1252_v33  ;;  %v1255_v35 = vsub.f32 %v1248_v32, %v1252_v33 }
 0x770   : > { %v1256_v59 = vadd.f32 %v1430_v55, %v1254_v40  ;;  %v1257_v61 = vadd.f32 %v1431_v36, %v1255_v35 }
 0x772   : > { %1258 = vst [vmem:[%s406_s19] sm:$0xff] %v1256_v59 }
 0x773   : > { %1259 = vst [vmem:[%s406_s19 + $0x8] sm:$0xff] %v1257_v61 }
 0x774   : > { %1459 = shalt.err (!%p1456_p3)
}
 0x775   : > { %1369 = dma.vmem_to_hbm [thread:$0]  (%p1612_p5), %s1275_s14, 256, %s1277_s18, %s1261_s24  }
 0x776 PF: > { %p1375_p4 = scmp.ge.s32.totalorder %s1494_s23, 2  ;;  %s1288_s17 = sand.u32 1, %s1482_s20  }
 0x777   : > { %s1289_s28 = scalar_lea.sflag [#allocation3], %s1288_s17 }
 0x778   : > { %p1372_p7 = pnand %p1375_p4, %p1616_p6 }
 0x77a   : > { %p1373_p8 = pneg %p1372_p7 }
 0x77c   : > { %1477 = dma.done.wait (%p1373_p8), %s1289_s28, 256  }
 0x77d   : > { %1479 = vsyncadd (%p1373_p8), %s1289_s28, 4294967040  ;;  %p22_p9 = scmp.ge.s32.totalorder %s1599_s26, 4   ;;  %s2294_s20 = smov %s1486_s21 }
 0x77e   : > { %s2295_s21 = smov %s1490_s22  ;;  %s2296_s22 = smov %s1610_s29 }
 0x77f   : > { %s2297_s23 = smov %s1599_s26  ;;  %24 = sbr.rel (!%p22_p9) target bundleno = 6 (0x6), region = 114 }
 0x784   :  { %1295 = vsyncpa [#allocation3], 1 }
 0x785   :  { %1297 = vsyncpa [#allocation3 + $0x1], 1 }

</bundles_post_ra>
